<compile_context>
chip_gen: v7x
topology: tpu7x:2x2x1
jax: 0.10.0
libtpu: 0.0.40
codegen_flags: <defaults>
</compile_context>

<pallas_src>
import functools

import jax
import jax.numpy as jnp
from jax.experimental import pallas as pl
from jax.experimental.pallas import tpu as pltpu


def _mean_pool_kernel(h_ref, m_ref, o_ref, cnt_ref, *, block_s, seq_len, mask_tail):
    """One grid step: accumulate masked sums for a (Bt, Ts, H) tile.

    h_ref   : (block_b, block_s, H)  hidden-state tile
    m_ref   : (block_b, block_s)     attention-mask tile (int)
    o_ref   : (block_b, H)  f32      output tile == running masked sum
    cnt_ref : (block_b, 1)  f32 VMEM running mask count
    """
    s_step = pl.program_id(1)

    @pl.when(s_step == 0)
    def _init():
        o_ref[...] = jnp.zeros_like(o_ref)
        cnt_ref[...] = jnp.zeros_like(cnt_ref)

    m = m_ref[...].astype(jnp.float32)                      # (Bt, Ts), Ts on lanes
    if mask_tail:
        # Last sequence block is ragged: zero everything past the real S.
        pos = (jax.lax.broadcasted_iota(jnp.int32, m.shape, 1)
               + s_step * block_s)
        valid = pos < seq_len                               # (Bt, Ts)
        m = jnp.where(valid, m, 0.0)

    cnt_ref[...] += jnp.sum(m, axis=1, keepdims=True)       # (Bt, 1) lane reduce

    h = h_ref[...]                                          # (Bt, Ts, H)
    prod = h * m[:, :, None].astype(h.dtype)                # mask is 0/1 -> exact
    if mask_tail:
        # Padded tail of the last block is uninitialized VMEM; NaN * 0 == NaN,
        # so explicitly select 0 for out-of-range positions.
        prod = jnp.where(valid[:, :, None], prod, jnp.zeros_like(prod))

    # Single full-tile accumulate into the resident f32 output block.
    o_ref[...] += jnp.sum(prod, axis=1, dtype=jnp.float32)  # (Bt, H)

    @pl.when(s_step == pl.num_programs(1) - 1)
    def _finalize():
        # torch.clamp(min=1e-9), then one exact per-row reciprocal + multiply.
        inv = 1.0 / jnp.maximum(cnt_ref[...], 1e-9)          # (Bt, 1)
        o_ref[...] = o_ref[...] * inv


def _vmem_tile_estimate(block_b, block_s, H, h_itemsize):
    """Rough per-step VMEM need: 2x-buffered inputs + f32 product + out + count."""
    h_tile = block_b * block_s * H * h_itemsize
    prod_f32 = block_b * block_s * H * 4          # masked product / reduce input
    m_tile = block_b * max(block_s, 128) * 4
    o_tile = block_b * max(H, 128) * 4
    cnt = block_b * 128 * 4
    return 2 * h_tile + prod_f32 + 2 * m_tile + 2 * o_tile + cnt


def _pick_block_b(B, S, H, h_itemsize, budget):
    """Rows per grid step: multiple of 8, as large as the VMEM budget allows."""
    if B <= 8:
        return B
    s_probe = min(S, 128)
    cands = [c for c in (128, 64, 32, 16, 8) if c <= B]
    fitting = [c for c in cands
               if _vmem_tile_estimate(c, s_probe, H, h_itemsize) <= budget]
    if not fitting:
        return 8
    # Prefer an even number of batch tiles: v7x shards the "parallel" grid axis
    # across its two TensorCores, and an odd count leaves one core idle.
    for c in fitting:
        n_blocks = -(-B // c)
        if n_blocks == 1 or n_blocks % 2 == 0:
            return c
    return fitting[0]


def _pick_block_s(block_b, S, H, h_itemsize, budget):
    """Sequence tile: whole S if it fits, else the largest fitting 128-multiple
    (preferring exact divisors of S; ragged tails are masked in-kernel)."""
    if S <= 128 or _vmem_tile_estimate(block_b, S, H, h_itemsize) <= budget:
        return S
    fitting = [d for d in range(128, S, 128)
               if _vmem_tile_estimate(block_b, d, H, h_itemsize) <= budget]
    if not fitting:
        return 128
    divisors = [d for d in fitting if S % d == 0]
    return max(divisors) if divisors else max(fitting)


def _default_vmem_limit():
    cap = 64 * 1024 * 1024
    try:
        info = pltpu.get_tpu_info()
        cap = int(getattr(info, "vmem_capacity_bytes", cap))
    except Exception:
        pass
    # ~96 MiB on v5e/v6e (128 MiB physical), ~48 MiB on v7x (64 MiB per TC).
    return min((cap * 3) // 4, 96 * 1024 * 1024)


def mean_pooling(last_hidden_state, attention_mask, *, vmem_limit_bytes=None):
    """Masked mean pooling matching PyTorch MeanPooling.forward semantics."""
    B, S, H = last_hidden_state.shape
    assert attention_mask.shape == (B, S)
    if attention_mask.dtype == jnp.bool_:
        attention_mask = attention_mask.astype(jnp.int32)

    if vmem_limit_bytes is None:
        vmem_limit_bytes = _default_vmem_limit()
    budget = max(vmem_limit_bytes - 2 * 1024 * 1024, 1 * 1024 * 1024)

    h_itemsize = jnp.dtype(last_hidden_state.dtype).itemsize
    block_b = _pick_block_b(B, S, H, h_itemsize, budget)
    block_s = _pick_block_s(block_b, S, H, h_itemsize, budget)
    mask_tail = (S % block_s) != 0

    grid = (pl.cdiv(B, block_b), pl.cdiv(S, block_s))
    kernel = functools.partial(_mean_pool_kernel, block_s=block_s,
                               seq_len=S, mask_tail=mask_tail)

    vmem_limit = int(min(
        max(vmem_limit_bytes,
            _vmem_tile_estimate(block_b, block_s, H, h_itemsize) + 2 * 1024 * 1024),
        128 * 1024 * 1024))

    return pl.pallas_call(
        kernel,
        out_shape=jax.ShapeDtypeStruct((B, H), jnp.float32),
        grid_spec=pltpu.PrefetchScalarGridSpec(
            num_scalar_prefetch=0,
            grid=grid,
            in_specs=[
                pl.BlockSpec((block_b, block_s, H), lambda i, s: (i, s, 0)),
                pl.BlockSpec((block_b, block_s), lambda i, s: (i, s)),
            ],
            out_specs=pl.BlockSpec((block_b, H), lambda i, s: (i, 0)),
            scratch_shapes=[
                pltpu.VMEM((block_b, 1), jnp.float32),   # mask-count accumulator
            ],
        ),
        compiler_params=pltpu.CompilerParams(
            dimension_semantics=("parallel", "arbitrary"),
            vmem_limit_bytes=vmem_limit,
        ),
    )(last_hidden_state, attention_mask)


def _mean_pooling_reference(last_hidden_state, attention_mask):
    m = attention_mask.astype(jnp.float32)[..., None]
    s = (last_hidden_state.astype(jnp.float32) * m).sum(axis=1)
    return s / jnp.maximum(m.sum(axis=1), 1e-9)


if __name__ == "__main__":
    key = jax.random.PRNGKey(0)
    keys = jax.random.split(key, 12)

    def check(hs, mask, **kw):
        out = mean_pooling(hs, mask, **kw)
        jax.block_until_ready(out)
        assert out.shape == (hs.shape[0], hs.shape[2]) and out.dtype == jnp.float32
        ref = _mean_pooling_reference(hs, mask)
        assert jnp.allclose(out, ref, atol=1e-5, rtol=1e-5)

    # 1. Single dense (8, H) output tile, single grid step.
    hs = jax.random.normal(keys[0], (8, 128, 256), dtype=jnp.float32)
    mk = (jax.random.uniform(keys[1], (8, 128)) > 0.3).astype(jnp.int32)
    check(hs, mk)

    # 2. Larger batch tile (Bt = 16) picked by the budget-aware selector.
    hs = jax.random.normal(keys[2], (16, 128, 256), dtype=jnp.float32)
    mk = (jax.random.uniform(keys[3], (16, 128)) > 0.3).astype(jnp.int32)
    check(hs, mk)

    # 3. Ragged batch (B % block_b != 0): padded rows are never written back.
    hs = jax.random.normal(keys[4], (12, 128, 256), dtype=jnp.float32)
    mk = (jax.random.uniform(keys[5], (12, 128)) > 0.3).astype(jnp.int32)
    check(hs, mk)

    # 4. Sequence tiling (output-resident accumulator path) via a tiny VMEM limit.
    hs = jax.random.normal(keys[6], (8, 384, 128), dtype=jnp.float32)
    mk = (jax.random.uniform(keys[7], (8, 384)) > 0.3).astype(jnp.int32)
    check(hs, mk, vmem_limit_bytes=4 * 1024 * 1024)

    # 5. Ragged sequence tail (S % block_s != 0) with in-kernel tail masking.
    hs = jax.random.normal(keys[8], (8, 320, 128), dtype=jnp.float32)
    mk = (jax.random.uniform(keys[9], (8, 320)) > 0.3).astype(jnp.int32)
    check(hs, mk, vmem_limit_bytes=4 * 1024 * 1024)

    # 6. Awkward S (not a multiple of 128) handled as a single whole-S block.
    hs = jax.random.normal(keys[10], (8, 100, 256), dtype=jnp.float32)
    mk = (jax.random.uniform(keys[11], (8, 100)) > 0.3).astype(jnp.int32)
    check(hs, mk)

    print("KERNEL_OK")
</pallas_src>

<mosaic_0001>
module attributes {stable_mosaic.version = 11 : i64} {
  func.func @_mean_pool_kernel(%arg0: i32, %arg1: i32, %arg2: memref<8x128x256xf32, #tpu.memory_space<vmem>>, %arg3: memref<8x128xi32, #tpu.memory_space<vmem>>, %arg4: memref<8x256xf32, #tpu.memory_space<vmem>>, %arg5: memref<8x1xf32, #tpu.memory_space<vmem>>) attributes {dimension_semantics = [#tpu.dimension_semantics<parallel>, #tpu.dimension_semantics<arbitrary>], iteration_bounds = array<i64: 1, 1>, scalar_prefetch = 0 : i64, scratch_operands = 1 : i64, tpu.core_type = #tpu.core_type<tc>, window_params = [{transform_indices = @transform_0, window_bounds = array<i64: 8, 128, 256>}, {transform_indices = @transform_1, window_bounds = array<i64: 8, 128>}, {transform_indices = @transform_2, window_bounds = array<i64: 8, 256>}]} {
    %c0_i32 = arith.constant 0 : i32
    %0 = arith.cmpi eq, %arg1, %c0_i32 : i32
    %1 = arith.extui %0 : i1 to i32
    %c0_i32_0 = arith.constant 0 : i32
    %2 = arith.cmpi ne, %1, %c0_i32_0 : i32
    scf.if %2 {
      %cst_16 = arith.constant 0.000000e+00 : f32
      %21 = vector.broadcast %cst_16 : f32 to vector<8x256xf32>
      %c0_17 = arith.constant 0 : index
      %c0_18 = arith.constant 0 : index
      %22 = vector.load %arg4[%c0_17, %c0_18] : memref<8x256xf32, #tpu.memory_space<vmem>>, vector<8x256xf32>
      tpu.vector_store %arg4[%c0_17, %c0_18], %21 {strides = array<i32>} : memref<8x256xf32, #tpu.memory_space<vmem>>, vector<8x256xf32>,
      %cst_19 = arith.constant 0.000000e+00 : f32
      %23 = vector.broadcast %cst_19 : f32 to vector<8x1xf32>
      %c0_20 = arith.constant 0 : index
      %c0_21 = arith.constant 0 : index
      %24 = vector.load %arg5[%c0_20, %c0_21] : memref<8x1xf32, #tpu.memory_space<vmem>>, vector<8x1xf32>
      tpu.vector_store %arg5[%c0_20, %c0_21], %23 {strides = array<i32>} : memref<8x1xf32, #tpu.memory_space<vmem>>, vector<8x1xf32>,
    } else {
    }
    %c0 = arith.constant 0 : index
    %c0_1 = arith.constant 0 : index
    %3 = vector.load %arg3[%c0, %c0_1] : memref<8x128xi32, #tpu.memory_space<vmem>>, vector<8x128xi32>
    %4 = arith.sitofp %3 : vector<8x128xi32> to vector<8x128xf32>
    %c0_2 = arith.constant 0 : index
    %c0_3 = arith.constant 0 : index
    %5 = vector.load %arg5[%c0_2, %c0_3] : memref<8x1xf32, #tpu.memory_space<vmem>>, vector<8x1xf32>
    %cst = arith.constant dense<0.000000e+00> : vector<8xf32>
    %6 = vector.multi_reduction <add>, %4, %cst [1] : vector<8x128xf32> to vector<8xf32>
    %7 = vector.shape_cast %6 : vector<8xf32> to vector<8x1xf32>
    %8 = arith.addf %5, %7 : vector<8x1xf32>
    %c0_4 = arith.constant 0 : index
    %c0_5 = arith.constant 0 : index
    %9 = vector.load %arg5[%c0_4, %c0_5] : memref<8x1xf32, #tpu.memory_space<vmem>>, vector<8x1xf32>
    tpu.vector_store %arg5[%c0_4, %c0_5], %8 {strides = array<i32>} : memref<8x1xf32, #tpu.memory_space<vmem>>, vector<8x1xf32>,
    %c0_6 = arith.constant 0 : index
    %c0_7 = arith.constant 0 : index
    %c0_8 = arith.constant 0 : index
    %10 = vector.load %arg2[%c0_6, %c0_7, %c0_8] : memref<8x128x256xf32, #tpu.memory_space<vmem>>, vector<8x128x256xf32>
    %11 = vector.shape_cast %4 : vector<8x128xf32> to vector<8x128x1xf32>
    %12 = vector.broadcast %11 : vector<8x128x1xf32> to vector<8x128x256xf32>
    %13 = arith.mulf %10, %12 : vector<8x128x256xf32>
    %c0_9 = arith.constant 0 : index
    %c0_10 = arith.constant 0 : index
    %14 = vector.load %arg4[%c0_9, %c0_10] : memref<8x256xf32, #tpu.memory_space<vmem>>, vector<8x256xf32>
    %cst_11 = arith.constant dense<0.000000e+00> : vector<8x256xf32>
    %15 = vector.multi_reduction <add>, %13, %cst_11 [1] : vector<8x128x256xf32> to vector<8x256xf32>
    %16 = arith.addf %14, %15 : vector<8x256xf32>
    %c0_12 = arith.constant 0 : index
    %c0_13 = arith.constant 0 : index
    %17 = vector.load %arg4[%c0_12, %c0_13] : memref<8x256xf32, #tpu.memory_space<vmem>>, vector<8x256xf32>
    tpu.vector_store %arg4[%c0_12, %c0_13], %16 {strides = array<i32>} : memref<8x256xf32, #tpu.memory_space<vmem>>, vector<8x256xf32>,
    %c0_i32_14 = arith.constant 0 : i32
    %18 = arith.cmpi eq, %arg1, %c0_i32_14 : i32
    %19 = arith.extui %18 : i1 to i32
    %c0_i32_15 = arith.constant 0 : i32
    %20 = arith.cmpi ne, %19, %c0_i32_15 : i32
    scf.if %20 {
      %c0_16 = arith.constant 0 : index
      %c0_17 = arith.constant 0 : index
      %21 = vector.load %arg5[%c0_16, %c0_17] : memref<8x1xf32, #tpu.memory_space<vmem>>, vector<8x1xf32>
      %cst_18 = arith.constant 9.99999971E-10 : f32
      %22 = vector.broadcast %cst_18 : f32 to vector<8x1xf32>
      %23 = arith.maximumf %21, %22 : vector<8x1xf32>
      %cst_19 = arith.constant 1.000000e+00 : f32
      %24 = vector.broadcast %cst_19 : f32 to vector<8x1xf32>
      %25 = arith.divf %24, %23 : vector<8x1xf32>
      %c0_20 = arith.constant 0 : index
      %c0_21 = arith.constant 0 : index
      %26 = vector.load %arg4[%c0_20, %c0_21] : memref<8x256xf32, #tpu.memory_space<vmem>>, vector<8x256xf32>
      %27 = vector.broadcast %25 : vector<8x1xf32> to vector<8x256xf32>
      %28 = arith.mulf %26, %27 : vector<8x256xf32>
      %c0_22 = arith.constant 0 : index
      %c0_23 = arith.constant 0 : index
      %29 = vector.load %arg4[%c0_22, %c0_23] : memref<8x256xf32, #tpu.memory_space<vmem>>, vector<8x256xf32>
      tpu.vector_store %arg4[%c0_22, %c0_23], %28 {strides = array<i32>} : memref<8x256xf32, #tpu.memory_space<vmem>>, vector<8x256xf32>,
    } else {
    }
    return
  }
  func.func @transform_0(%arg0: i32, %arg1: i32) -> (i32, i32, i32) {
    %c0_i32 = arith.constant 0 : i32
    %c0_i32_0 = arith.constant 0 : i32
    return %arg0, %arg1, %c0_i32 : i32, i32, i32
  }
  func.func @transform_1(%arg0: i32, %arg1: i32) -> (i32, i32) {
    %c0_i32 = arith.constant 0 : i32
    return %arg0, %arg1 : i32, i32
  }
  func.func @transform_2(%arg0: i32, %arg1: i32) -> (i32, i32) {
    %c0_i32 = arith.constant 0 : i32
    %c0_i32_0 = arith.constant 0 : i32
    return %arg0, %c0_i32 : i32, i32
  }
}

</mosaic_0001>

<bundles_post_ra>
// kernel: tpu_custom_call.1
= control target key start
LH: loop header
LB: loop body
LE: loop exit
PB: predicated region body
PF: predicated region fallthrough
CT: control target
= control target key end

     0   :  { %7 = vsyncpa [#allocation4], 0  ;;  %s1937_s0 = inlined_call_operand.hbm [shape: f32[8,128,256], index: 0, kind: input, shape index: {}]   ;;  %s1938_s1 = inlined_call_operand.hbm [shape: s32[8,128], index: 1, kind: input, shape index: {}]   ;;  %s1939_s2 = inlined_call_operand.hbm [shape: f32[8,256], index: 2, kind: output, shape index: {}]  }
   0x1   :  { %8 = vsyncpa [#allocation7], 0 }
   0x2   :  { %9 = vsyncpa [#allocation5], 0  ;;  %s1599_s9 = smov [#allocation3]   ;;  %s1527_s13 = scalar_lea.hbm %s1937_s0, 32768 }
   0x3   :  { %s15_s10 = sshll.u32 %s1599_s9, 4  ;;  %p1528_p0 = scmp.ne.s32.totalorder %s1937_s0, %s1527_s13  ;;  %s16_s10 = int_to_ptr.vmem [resolvable:$true] %s15_s10 }
   0x4   :  { %p1531_p1 = scmp.lt.u32.totalorder %s1527_s13, %s1937_s0 }
   0x6   :  { %p1533_p2 = pnand %p1531_p1, %p1528_p0 }
   0x8   :  { %1536 = shalt.err (!%p1533_p2)
}
   0x9   :  { %s1537_s18 = scalar_lea.vmem %s16_s10, 32768  ;;  %p1542_p4 = scmp.lt.s32.totalorder %s16_s10, %s16_s10 }
   0xa   :  { %p1538_p3 = scmp.ne.s32.totalorder %s16_s10, %s1537_s18  ;;  %p1543_p5 = scmp.lt.s32.totalorder %s1537_s18, %s1537_s18 }
   0xc   :  { %p1544_p6 = por %p1543_p5, %p1542_p4 }
   0xe   :  { %p1545_p7 = pnand %p1544_p6, %p1538_p3 }
  0x10   :  { %1548 = shalt.err (!%p1545_p7)
}
  0x11   :  { %s1600_s19 = smov 256   ;;  %s1601_s20 = smov 16  }
  0x12   :  { %21 = dma.hbm_to_vmem [thread:$0]  %s1937_s0, 32768, %s16_s10, [#allocation4], %s1600_s19, %s1600_s19, %s1601_s20  }
  0x13   :  { %s1602_s23 = smov [#allocation6]   ;;  %s1549_s27 = scalar_lea.hbm %s1938_s1, 128 }
  0x14   :  { %s28_s24 = sshll.u32 %s1602_s23, 4  ;;  %p1550_p8 = scmp.ne.s32.totalorder %s1938_s1, %s1549_s27  ;;  %s29_s24 = int_to_ptr.vmem [resolvable:$true] %s28_s24 }
  0x15   :  { %p1553_p9 = scmp.lt.u32.totalorder %s1549_s27, %s1938_s1 }
  0x17   :  { %p1555_p10 = pnand %p1553_p9, %p1550_p8 }
  0x19   :  { %1558 = shalt.err (!%p1555_p10)
}
  0x1a   :  { %s1559_s4 = scalar_lea.vmem %s29_s24, 128  ;;  %p1564_p12 = scmp.lt.s32.totalorder %s29_s24, %s29_s24 }
  0x1b   :  { %p1560_p11 = scmp.ne.s32.totalorder %s29_s24, %s1559_s4  ;;  %p1565_p13 = scmp.lt.s32.totalorder %s1559_s4, %s1559_s4 }
  0x1d   :  { %p1566_p0 = por %p1565_p13, %p1564_p12 }
  0x1f   :  { %p1567_p1 = pnand %p1566_p0, %p1560_p11 }
  0x21   :  { %1570 = shalt.err (!%p1567_p1)
}
  0x22   :  { %31 = dma.hbm_to_vmem [thread:$0]  %s1938_s1, 128, %s29_s24, [#allocation7]  }
  0x23   :  { %1593 = dma.done.wait [#allocation4], 32768  }
  0x24   :  { %1594 = vsyncadd [#allocation4], 4294934528 }
  0x25   :  { %1595 = dma.done.wait [#allocation7], 128  }
  0x26   :  { %1596 = vsyncadd [#allocation7], 4294967168  ;;  %v310_v0 = vlaneseq  ;;  %v46_v5 = vld [vmem:[#allocation6] sm:$0xff]  ;;  %vm44_vm0 = vcmask 7168   ;;  %v1603_v18 = vmov 0.0   ;;  %v1604_v28 = vmov 0  }
  0x27   :  { %v47_v10 = vcvt.s32.f32 %v46_v5  ;;  %45 = vst.msk [vmem:[#allocation2] sm:$0xff] %vm44_vm0, %v1603_v18  ;;  %1524 = vset.pattern.permute.xlu0 %v1604_v28  ;;  %v54_v34 = vld [vmem:[#allocation3] sm:$0xff]  ;;  %v55_v35 = vld [vmem:[#allocation3 + $0x8] sm:$0xff]  ;;  %v56_v36 = vld [vmem:[#allocation3 + $0x10] sm:$0xff]  ;;  %vm1456_vm1 = vcmask 1041409   ;;  %vm1458_vm2 = vcmask 1042434  }
  0x28   :  { %v311_v1 = vshrl.u32 %v310_v0, 7  ;;  %v57_v37 = vld [vmem:[#allocation3 + $0x18] sm:$0xff]  ;;  %v58_v44 = vld [vmem:[#allocation3 + $0x20] sm:$0xff]  ;;  %v59_v45 = vld [vmem:[#allocation3 + $0x28] sm:$0xff]  ;;  %vm1460_vm3 = vcmask 1043459   ;;  %vm1462_vm4 = vcmask 1044484  }
  0x29   :  { %49 = vadd.xlane.f32.xlu0 %v47_v10  ;;  %v60_v52 = vld [vmem:[#allocation3 + $0x30] sm:$0xff]  ;;  %v61_v53 = vld [vmem:[#allocation3 + $0x38] sm:$0xff]  ;;  %v62_v60 = vld [vmem:[#allocation3 + $0x40] sm:$0xff]  ;;  %vm1464_vm5 = vcmask 1045509   ;;  %vm1466_vm6 = vcmask 1046534   ;;  %vm1468_vm7 = vcmask 1047559  }
  0x2a   :  { %v312_v2 = vsub.s32 0, %v311_v1  ;;  %v446_v3 = vsub.s32 2, %v311_v1  ;;  %v513_v4 = vsub.s32 3, %v311_v1  ;;  %v580_v6 = vsub.s32 4, %v311_v1  ;;  %v63_v61 = vld [vmem:[#allocation3 + $0x48] sm:$0xff]  ;;  %v89_v5 = vld [vmem:[#allocation3 + $0x118] sm:$0xff] }
  0x2b   :  { %v647_v7 = vsub.s32 5, %v311_v1  ;;  %v714_v8 = vsub.s32 6, %v311_v1  ;;  %v781_v9 = vsub.s32 7, %v311_v1  ;;  %v379_v19 = vsub.s32 1, %v311_v1  ;;  %v90_v28 = vld [vmem:[#allocation3 + $0x120] sm:$0xff]  ;;  %s1605_s1 = smov [#allocation8]  }
  0x2c   :  { %v313_v11 = vrot.slane %v47_v10, %v312_v2  ;;  %v447_v12 = vrot.slane %v47_v10, %v446_v3  ;;  %v1645_v13 = vrot.slane %v47_v10, %v513_v4  ;;  %v1647_v14 = vrot.slane %v47_v10, %v580_v6  ;;  %v88_v2 = vld [vmem:[#allocation3 + $0x110] sm:$0xff]  ;;  %v86_v6 = vld [vmem:[#allocation3 + $0x100] sm:$0xff]  ;;  %s1507_s6 = sshll.u32 %s1605_s1, 4  ;;  %s1508_s6 = int_to_ptr.vmem [resolvable:$true] %s1507_s6 }
  0x2d   :  { %v1649_v15 = vrot.slane %v47_v10, %v647_v7  ;;  %v1651_v16 = vrot.slane %v47_v10, %v714_v8  ;;  %v1653_v17 = vrot.slane %v47_v10, %v781_v9  ;;  %v380_v20 = vrot.slane %v47_v10, %v379_v19  ;;  %v87_v7 = vld [vmem:[#allocation3 + $0x108] sm:$0xff]  ;;  %v64_v8 = vld [vmem:[#allocation3 + $0x50] sm:$0xff]  ;;  %v65_v9 = vld [vmem:[#allocation3 + $0x58] sm:$0xff]  ;;  %s1571_s7 = scalar_lea.vmem %s1508_s6, 256  ;;  %p1576_p3 = scmp.lt.s32.totalorder %s1508_s6, %s1508_s6 }
  0x2e   :  { %319 = vbcast.lane.b32.xlu1 %v313_v11, 264  ;;  %v48_v27 = vld [vmem:[#allocation2] sm:$0xff]  ;;  %p1572_p2 = scmp.ne.s32.totalorder %s1508_s6, %s1571_s7  ;;  %p1577_p4 = scmp.lt.s32.totalorder %s1571_s7, %s1571_s7 }
  0x30   :  { %p1578_p5 = por %p1577_p4, %p1576_p3 }
  0x32   :  { %323 = vbcast.lane.b32.xlu1 %v313_v11, 272  ;;  %p1579_p6 = pnand %p1578_p5, %p1572_p2 }
  0x36   :  { %327 = vbcast.lane.b32.xlu1 %v313_v11, 280 }
  0x3a   :  { %331 = vbcast.lane.b32.xlu1 %v313_v11, 288 }
  0x3e   :  { %335 = vbcast.lane.b32.xlu1 %v313_v11, 296 }
  0x3f   :  { %315 = vbcast.lane.b32.xlu0 %v313_v11, 256 }
  0x42   :  { %339 = vbcast.lane.b32.xlu1 %v313_v11, 304 }
  0x43   :  { %347 = vbcast.lane.b32.xlu0 %v313_v11, 320 }
  0x46   :  { %343 = vbcast.lane.b32.xlu1 %v313_v11, 312 }
  0x47   :  { %355 = vbcast.lane.b32.xlu0 %v313_v11, 336 }
  0x4a   :  { %351 = vbcast.lane.b32.xlu1 %v313_v11, 328 }
  0x4b   :  { %363 = vbcast.lane.b32.xlu0 %v313_v11, 352 }
  0x4e   :  { %359 = vbcast.lane.b32.xlu1 %v313_v11, 344 }
  0x4f   :  { %371 = vbcast.lane.b32.xlu0 %v313_v11, 368 }
  0x52   :  { %367 = vbcast.lane.b32.xlu1 %v313_v11, 360 }
  0x53   :  { %382 = vbcast.lane.b32.xlu0 %v380_v20, 256 }
  0x56   :  { %375 = vbcast.lane.b32.xlu1 %v313_v11, 376 }
  0x57   :  { %390 = vbcast.lane.b32.xlu0 %v380_v20, 272 }
  0x5a   :  { %386 = vbcast.lane.b32.xlu1 %v380_v20, 264 }
  0x5b   :  { %398 = vbcast.lane.b32.xlu0 %v380_v20, 288 }
  0x5e   :  { %394 = vbcast.lane.b32.xlu1 %v380_v20, 280 }
  0x5f   :  { %406 = vbcast.lane.b32.xlu0 %v380_v20, 304 }
  0x62   :  { %402 = vbcast.lane.b32.xlu1 %v380_v20, 296 }
  0x63   :  { %414 = vbcast.lane.b32.xlu0 %v380_v20, 320 }
  0x66   :  { %410 = vbcast.lane.b32.xlu1 %v380_v20, 312 }
  0x67   :  { %422 = vbcast.lane.b32.xlu0 %v380_v20, 336 }
  0x6a   :  { %418 = vbcast.lane.b32.xlu1 %v380_v20, 328 }
  0x6b   :  { %430 = vbcast.lane.b32.xlu0 %v380_v20, 352 }
  0x6e   :  { %426 = vbcast.lane.b32.xlu1 %v380_v20, 344 }
  0x6f   :  { %438 = vbcast.lane.b32.xlu0 %v380_v20, 368 }
  0x72   :  { %434 = vbcast.lane.b32.xlu1 %v380_v20, 360 }
  0x73   :  { %449 = vbcast.lane.b32.xlu0 %v447_v12, 256 }
  0x76   :  { %442 = vbcast.lane.b32.xlu1 %v380_v20, 376  ;;  %v92_v20 = vld [vmem:[#allocation3 + $0x130] sm:$0xff] }
  0x77   :  { %457 = vbcast.lane.b32.xlu0 %v447_v12, 272 }
  0x7a   :  { %453 = vbcast.lane.b32.xlu1 %v447_v12, 264 }
  0x7b   :  { %465 = vbcast.lane.b32.xlu0 %v447_v12, 288 }
  0x7e   :  { %461 = vbcast.lane.b32.xlu1 %v447_v12, 280 }
  0x7f   :  { %473 = vbcast.lane.b32.xlu0 %v447_v12, 304 }
  0x82   :  { %469 = vbcast.lane.b32.xlu1 %v447_v12, 296 }
  0x83   :  { %481 = vbcast.lane.b32.xlu0 %v447_v12, 320 }
  0x86   :  { %477 = vbcast.lane.b32.xlu1 %v447_v12, 312 }
  0x87   :  { %489 = vbcast.lane.b32.xlu0 %v447_v12, 336 }
  0x8a   :  { %485 = vbcast.lane.b32.xlu1 %v447_v12, 328 }
  0x8b   :  { %497 = vbcast.lane.b32.xlu0 %v447_v12, 352 }
  0x8e   :  { %493 = vbcast.lane.b32.xlu1 %v447_v12, 344 }
  0x8f   :  { %505 = vbcast.lane.b32.xlu0 %v447_v12, 368 }
  0x92   :  { %501 = vbcast.lane.b32.xlu1 %v447_v12, 360 }
  0x93   :  { %516 = vbcast.lane.b32.xlu0 %v1645_v13, 256 }
  0x96   :  { %509 = vbcast.lane.b32.xlu1 %v447_v12, 376 }
  0x97   :  { %524 = vbcast.lane.b32.xlu0 %v1645_v13, 272 }
  0x9a   :  { %520 = vbcast.lane.b32.xlu1 %v1645_v13, 264 }
  0x9b   :  { %532 = vbcast.lane.b32.xlu0 %v1645_v13, 288 }
  0x9e   :  { %528 = vbcast.lane.b32.xlu1 %v1645_v13, 280 }
  0x9f   :  { %540 = vbcast.lane.b32.xlu0 %v1645_v13, 304 }
  0xa0   :  { %v320_v21 = vpop.permute.xlu1 %319 }
  0xa1   :  { %v848_v42 = vmul.f32 %v320_v21, %v56_v36  ;;  %v849_v43 = vmul.f32 %v320_v21, %v57_v37  ;;  %v93_v21 = vld [vmem:[#allocation3 + $0x138] sm:$0xff] }
  0xa2   :  { %536 = vbcast.lane.b32.xlu1 %v1645_v13, 296 }
  0xa3   :  { %548 = vbcast.lane.b32.xlu0 %v1645_v13, 320 }
  0xa4   :  { %v324_v22 = vpop.permute.xlu1 %323 }
  0xa5   :  { %v850_v50 = vmul.f32 %v324_v22, %v58_v44  ;;  %v851_v51 = vmul.f32 %v324_v22, %v59_v45 }
  0xa6   :  { %544 = vbcast.lane.b32.xlu1 %v1645_v13, 312 }
  0xa7   :  { %556 = vbcast.lane.b32.xlu0 %v1645_v13, 336 }
  0xa8   :  { %v328_v23 = vpop.permute.xlu1 %327 }
  0xa9   :  { %v852_v58 = vmul.f32 %v328_v23, %v60_v52  ;;  %v853_v59 = vmul.f32 %v328_v23, %v61_v53 }
  0xaa   :  { %552 = vbcast.lane.b32.xlu1 %v1645_v13, 328 }
  0xab   :  { %564 = vbcast.lane.b32.xlu0 %v1645_v13, 352 }
  0xac   :  { %v1667_v24 = vpop.permute.xlu1 %331 }
  0xad   :  { %v854_v3 = vmul.f32 %v1667_v24, %v62_v60  ;;  %v855_v4 = vmul.f32 %v1667_v24, %v63_v61 }
  0xae   :  { %560 = vbcast.lane.b32.xlu1 %v1645_v13, 344 }
  0xaf   :  { %572 = vbcast.lane.b32.xlu0 %v1645_v13, 368 }
  0xb0   :  { %v1671_v25 = vpop.permute.xlu1 %335 }
  0xb1   :  { %v856_v24 = vmul.f32 %v1671_v25, %v64_v8 }
  0xb2   :  { %568 = vbcast.lane.b32.xlu1 %v1645_v13, 360 }
  0xb3   :  { %583 = vbcast.lane.b32.xlu0 %v1647_v14, 256 }
  0xb4   :  { %v1675_v26 = vpop.permute.xlu1 %339 }
  0xb6   :  { %576 = vbcast.lane.b32.xlu1 %v1645_v13, 376  ;;  %v50_v30 = vpop.xlane.xlu0 %49 }
  0xb7   :  { %v51_v31 = vadd.f32 %v50_v30, %v48_v27  ;;  %591 = vbcast.lane.b32.xlu0 %v1647_v14, 272  ;;  %v857_v27 = vmul.f32 %v1671_v25, %v65_v9  ;;  %v91_v30 = vld [vmem:[#allocation3 + $0x128] sm:$0xff]  ;;  %v94_v25 = vld [vmem:[#allocation3 + $0x140] sm:$0xff]  ;;  %v100_v9 = vld [vmem:[#allocation3 + $0x170] sm:$0xff] }
  0xb8   :  { %v1679_v29 = vpop.permute.xlu1 %343 }
  0xb9   :  { %53 = vst.msk [vmem:[#allocation2] sm:$0xff] %vm44_vm0, %v51_v31 }
  0xba   :  { %587 = vbcast.lane.b32.xlu1 %v1647_v14, 264  ;;  %v316_v33 = vpop.permute.xlu0 %315 }
  0xbb   :  { %599 = vbcast.lane.b32.xlu0 %v1647_v14, 288  ;;  %v846_v39 = vmul.f32 %v316_v33, %v54_v34  ;;  %v847_v40 = vmul.f32 %v316_v33, %v55_v35  ;;  %v66_v33 = vld [vmem:[#allocation3 + $0x60] sm:$0xff]  ;;  %v67_v34 = vld [vmem:[#allocation3 + $0x68] sm:$0xff] }
  0xbc   :  { %v1684_v32 = vpop.permute.xlu1 %351 }
  0xbd   :  { %v1104_v47 = vadd.f32 %v848_v42, %v846_v39  ;;  %v1125_v48 = vadd.f32 %v849_v43, %v847_v40 }
  0xbe   :  { %595 = vbcast.lane.b32.xlu1 %v1647_v14, 280  ;;  %v1690_v41 = vpop.permute.xlu0 %347 }
  0xbf   :  { %607 = vbcast.lane.b32.xlu0 %v1647_v14, 304  ;;  %v1105_v55 = vadd.f32 %v1104_v47, %v850_v50  ;;  %v1126_v56 = vadd.f32 %v1125_v48, %v851_v51  ;;  %v858_v47 = vmul.f32 %v1675_v26, %v66_v33  ;;  %v859_v48 = vmul.f32 %v1675_v26, %v67_v34  ;;  %v96_v50 = vld [vmem:[#allocation3 + $0x150] sm:$0xff]  ;;  %v97_v51 = vld [vmem:[#allocation3 + $0x158] sm:$0xff]  ;;  %v98_v26 = vld [vmem:[#allocation3 + $0x160] sm:$0xff] }
  0xc0   :  { %v1688_v38 = vpop.permute.xlu1 %359  ;;  %v103_v33 = vld [vmem:[#allocation3 + $0x188] sm:$0xff] }
  0xc1   :  { %v1106_v63 = vadd.f32 %v1105_v55, %v852_v58  ;;  %v1127_v0 = vadd.f32 %v1126_v56, %v853_v59  ;;  %v95_v56 = vld [vmem:[#allocation3 + $0x148] sm:$0xff]  ;;  %v68_v58 = vld [vmem:[#allocation3 + $0x70] sm:$0xff]  ;;  %v69_v59 = vld [vmem:[#allocation3 + $0x78] sm:$0xff] }
  0xc2   :  { %603 = vbcast.lane.b32.xlu1 %v1647_v14, 296  ;;  %v1696_v49 = vpop.permute.xlu0 %355  ;;  %v861_v8 = vmul.f32 %v1679_v29, %v69_v59 }
  0xc3   :  { %654 = vbcast.lane.b32.xlu0 %v1649_v15, 264  ;;  %v1107_v11 = vadd.f32 %v1106_v63, %v854_v3  ;;  %v1128_v12 = vadd.f32 %v1127_v0, %v855_v4 }
  0xc4   :  { %v1694_v46 = vpop.permute.xlu1 %367 }
  0xc5   :  { %v1108_v35 = vadd.f32 %v1107_v11, %v856_v24  ;;  %v1129_v36 = vadd.f32 %v1128_v12, %v857_v27 }
  0xc6   :  { %650 = vbcast.lane.b32.xlu1 %v1649_v15, 256  ;;  %v1702_v57 = vpop.permute.xlu0 %363 }
  0xc7   :  { %721 = vbcast.lane.b32.xlu0 %v1651_v16, 264  ;;  %v1109_v61 = vadd.f32 %v1108_v35, %v858_v47  ;;  %v72_v35 = vld [vmem:[#allocation3 + $0x90] sm:$0xff] }
  0xc8   :  { %v1700_v54 = vpop.permute.xlu1 %375 }
  0xca   :  { %717 = vbcast.lane.b32.xlu1 %v1651_v16, 256  ;;  %v1706_v1 = vpop.permute.xlu0 %371 }
  0xcb   :  { %784 = vbcast.lane.b32.xlu0 %v1653_v17, 256 }
  0xcc   :  { %v387_v62 = vpop.permute.xlu1 %386 }
  0xcd   :  { %v880_v18 = vmul.f32 %v387_v62, %v88_v2  ;;  %v881_v19 = vmul.f32 %v387_v62, %v89_v5  ;;  %v1130_v62 = vadd.f32 %v1129_v36, %v859_v48  ;;  %v73_v36 = vld [vmem:[#allocation3 + $0x98] sm:$0xff] }
  0xce   :  { %658 = vbcast.lane.b32.xlu1 %v1649_v15, 272  ;;  %v383_v13 = vpop.permute.xlu0 %382 }
  0xcf   :  { %v878_v22 = vmul.f32 %v383_v13, %v86_v6  ;;  %v879_v23 = vmul.f32 %v383_v13, %v87_v7  ;;  %725 = vbcast.lane.b32.xlu0 %v1651_v16, 272  ;;  %v99_v6 = vld [vmem:[#allocation3 + $0x168] sm:$0xff]  ;;  %v860_v7 = vmul.f32 %v1679_v29, %v68_v58  ;;  %v102_v29 = vld [vmem:[#allocation3 + $0x180] sm:$0xff] }
  0xd0   :  { %v395_v10 = vpop.permute.xlu1 %394  ;;  %v75_v58 = vld [vmem:[#allocation3 + $0xa8] sm:$0xff] }
  0xd1   :  { %v884_v37 = vmul.f32 %v395_v10, %v92_v20  ;;  %v885_v39 = vmul.f32 %v395_v10, %v93_v21  ;;  %v1146_v42 = vadd.f32 %v880_v18, %v878_v22  ;;  %v1167_v43 = vadd.f32 %v881_v19, %v879_v23  ;;  %v101_v10 = vld [vmem:[#allocation3 + $0x178] sm:$0xff]  ;;  %v70_v19 = vld [vmem:[#allocation3 + $0x80] sm:$0xff]  ;;  %v71_v20 = vld [vmem:[#allocation3 + $0x88] sm:$0xff] }
  0xd2   :  { %788 = vbcast.lane.b32.xlu1 %v1653_v17, 264  ;;  %v391_v40 = vpop.permute.xlu0 %390  ;;  %v1110_v21 = vadd.f32 %v1109_v61, %v860_v7  ;;  %v1131_v22 = vadd.f32 %v1130_v62, %v861_v8  ;;  %v77_v7 = vld [vmem:[#allocation3 + $0xb8] sm:$0xff] }
  0xd3   :  { %v882_v44 = vmul.f32 %v391_v40, %v90_v28  ;;  %v883_v45 = vmul.f32 %v391_v40, %v91_v30  ;;  %792 = vbcast.lane.b32.xlu0 %v1653_v17, 272 }
  0xd4   :  { %v403_v31 = vpop.permute.xlu1 %402 }
  0xd5   :  { %v1147_v52 = vadd.f32 %v1146_v42, %v882_v44  ;;  %v1168_v53 = vadd.f32 %v1167_v43, %v883_v45  ;;  %v888_v2 = vmul.f32 %v403_v31, %v96_v50  ;;  %v889_v3 = vmul.f32 %v403_v31, %v97_v51  ;;  %v104_v44 = vld [vmem:[#allocation3 + $0x190] sm:$0xff]  ;;  %v105_v45 = vld [vmem:[#allocation3 + $0x198] sm:$0xff] }
  0xd6   :  { %662 = vbcast.lane.b32.xlu1 %v1649_v15, 280  ;;  %v399_v60 = vpop.permute.xlu0 %398 }
  0xd7   :  { %v1148_v63 = vadd.f32 %v1147_v52, %v884_v37  ;;  %v1169_v0 = vadd.f32 %v1168_v53, %v885_v39  ;;  %v886_v4 = vmul.f32 %v399_v60, %v94_v25  ;;  %v887_v5 = vmul.f32 %v399_v60, %v95_v56  ;;  %666 = vbcast.lane.b32.xlu0 %v1649_v15, 288  ;;  %v74_v56 = vld [vmem:[#allocation3 + $0xa0] sm:$0xff] }
  0xd8   :  { %v411_v55 = vpop.permute.xlu1 %410  ;;  %v862_v37 = vmul.f32 %v1690_v41, %v70_v19  ;;  %v863_v39 = vmul.f32 %v1690_v41, %v71_v20  ;;  %v864_v53 = vmul.f32 %v1684_v32, %v72_v35 }
  0xd9   :  { %v1149_v12 = vadd.f32 %v1148_v63, %v886_v4  ;;  %v1170_v13 = vadd.f32 %v1169_v0, %v887_v5  ;;  %v892_v27 = vmul.f32 %v411_v55, %v100_v9  ;;  %v893_v28 = vmul.f32 %v411_v55, %v101_v10  ;;  %v106_v0 = vld [vmem:[#allocation3 + $0x1a0] sm:$0xff] }
  0xda   :  { %729 = vbcast.lane.b32.xlu1 %v1651_v16, 280  ;;  %v407_v18 = vpop.permute.xlu0 %406  ;;  %v1111_v48 = vadd.f32 %v1110_v21, %v862_v37  ;;  %v1132_v50 = vadd.f32 %v1131_v22, %v863_v39  ;;  %v865_v55 = vmul.f32 %v1684_v32, %v73_v36  ;;  %v866_v5 = vmul.f32 %v1696_v49, %v74_v56  ;;  %v78_v22 = vld [vmem:[#allocation3 + $0xc0] sm:$0xff]  ;;  %v111_v37 = vld [vmem:[#allocation3 + $0x1c8] sm:$0xff]  ;;  %v112_v56 = vld [vmem:[#allocation3 + $0x1d0] sm:$0xff] }
  0xdb   :  { %v890_v23 = vmul.f32 %v407_v18, %v98_v26  ;;  %v891_v24 = vmul.f32 %v407_v18, %v99_v6  ;;  %v1150_v30 = vadd.f32 %v1149_v12, %v888_v2  ;;  %v1171_v31 = vadd.f32 %v1170_v13, %v889_v3  ;;  %733 = vbcast.lane.b32.xlu0 %v1651_v16, 288  ;;  %v107_v2 = vld [vmem:[#allocation3 + $0x1a8] sm:$0xff]  ;;  %v76_v6 = vld [vmem:[#allocation3 + $0xb0] sm:$0xff]  ;;  %v109_v18 = vld [vmem:[#allocation3 + $0x1b8] sm:$0xff] }
  0xdc   :  { %v419_v11 = vpop.permute.xlu1 %418  ;;  %v1112_v3 = vadd.f32 %v1111_v48, %v864_v53  ;;  %v1133_v4 = vadd.f32 %v1132_v50, %v865_v55  ;;  %v867_v32 = vmul.f32 %v1696_v49, %v75_v58  ;;  %v108_v13 = vld [vmem:[#allocation3 + $0x1b0] sm:$0xff]  ;;  %v868_v21 = vmul.f32 %v1688_v38, %v76_v6  ;;  %v110_v36 = vld [vmem:[#allocation3 + $0x1c0] sm:$0xff]  ;;  %v81_v48 = vld [vmem:[#allocation3 + $0xd8] sm:$0xff] }
  0xdd   :  { %v1151_v40 = vadd.f32 %v1150_v30, %v890_v23  ;;  %v1172_v42 = vadd.f32 %v1171_v31, %v891_v24  ;;  %v896_v59 = vmul.f32 %v419_v11, %v104_v44  ;;  %v897_v60 = vmul.f32 %v419_v11, %v105_v45  ;;  %v79_v24 = vld [vmem:[#allocation3 + $0xc8] sm:$0xff]  ;;  %v113_v58 = vld [vmem:[#allocation3 + $0x1d8] sm:$0xff] }
  0xde   :  { %796 = vbcast.lane.b32.xlu1 %v1653_v17, 280  ;;  %v415_v43 = vpop.permute.xlu0 %414  ;;  %v1113_v19 = vadd.f32 %v1112_v3, %v866_v5  ;;  %v1134_v20 = vadd.f32 %v1133_v4, %v867_v32  ;;  %v869_v49 = vmul.f32 %v1688_v38, %v77_v7  ;;  %v118_v38 = vld [vmem:[#allocation3 + $0x200] sm:$0xff]  ;;  %v873_v4 = vmul.f32 %v1694_v46, %v81_v48  ;;  %v83_v32 = vld [vmem:[#allocation3 + $0xe8] sm:$0xff]  ;;  %v133_v48 = vld [vmem:[#allocation3 + $0x278] sm:$0xff] }
  0xdf   :  { %v894_v25 = vmul.f32 %v415_v43, %v102_v29  ;;  %v895_v47 = vmul.f32 %v415_v43, %v103_v33  ;;  %v1152_v51 = vadd.f32 %v1151_v40, %v892_v27  ;;  %v1173_v52 = vadd.f32 %v1172_v42, %v893_v28  ;;  %800 = vbcast.lane.b32.xlu0 %v1653_v17, 288  ;;  %v120_v29 = vld [vmem:[#allocation3 + $0x210] sm:$0xff]  ;;  %v121_v33 = vld [vmem:[#allocation3 + $0x218] sm:$0xff]  ;;  %v119_v42 = vld [vmem:[#allocation3 + $0x208] sm:$0xff] }
  0xe0   :  { %v427_v34 = vpop.permute.xlu1 %426  ;;  %v1114_v39 = vadd.f32 %v1113_v19, %v868_v21  ;;  %v1135_v40 = vadd.f32 %v1134_v20, %v869_v49  ;;  %v870_v43 = vmul.f32 %v1702_v57, %v78_v22  ;;  %v82_v5 = vld [vmem:[#allocation3 + $0xe0] sm:$0xff]  ;;  %v128_v49 = vld [vmem:[#allocation3 + $0x250] sm:$0xff]  ;;  %v129_v22 = vld [vmem:[#allocation3 + $0x258] sm:$0xff] }
  0xe1   :  { %v1153_v61 = vadd.f32 %v1152_v51, %v894_v25  ;;  %v1174_v62 = vadd.f32 %v1173_v52, %v895_v47  ;;  %v900_v27 = vmul.f32 %v427_v34, %v108_v13  ;;  %v901_v28 = vmul.f32 %v427_v34, %v109_v18  ;;  %v80_v47 = vld [vmem:[#allocation3 + $0xd0] sm:$0xff]  ;;  %v114_v13 = vld [vmem:[#allocation3 + $0x1e0] sm:$0xff]  ;;  %v115_v18 = vld [vmem:[#allocation3 + $0x1e8] sm:$0xff] }
  0xe2   :  { %670 = vbcast.lane.b32.xlu1 %v1649_v15, 296  ;;  %v423_v63 = vpop.permute.xlu0 %422  ;;  %v871_v34 = vmul.f32 %v1702_v57, %v79_v24  ;;  %v124_v57 = vld [vmem:[#allocation3 + $0x230] sm:$0xff]  ;;  %v872_v3 = vmul.f32 %v1694_v46, %v80_v47 }
  0xe3   :  { %674 = vbcast.lane.b32.xlu0 %v1649_v15, 304  ;;  %v1154_v8 = vadd.f32 %v1153_v61, %v896_v59  ;;  %v1175_v9 = vadd.f32 %v1174_v62, %v897_v60  ;;  %v898_v10 = vmul.f32 %v423_v63, %v106_v0  ;;  %v899_v11 = vmul.f32 %v423_v63, %v107_v2  ;;  %v122_v61 = vld [vmem:[#allocation3 + $0x220] sm:$0xff]  ;;  %v125_v0 = vld [vmem:[#allocation3 + $0x238] sm:$0xff]  ;;  %v123_v2 = vld [vmem:[#allocation3 + $0x228] sm:$0xff] }
  0xe4   :  { %v1732_v41 = vpop.permute.xlu1 %434  ;;  %v1115_v62 = vadd.f32 %v1114_v39, %v870_v43  ;;  %v1136_v63 = vadd.f32 %v1135_v40, %v871_v34  ;;  %v117_v43 = vld [vmem:[#allocation3 + $0x1f8] sm:$0xff]  ;;  %v132_v47 = vld [vmem:[#allocation3 + $0x270] sm:$0xff] }
  0xe5   :  { %v1155_v30 = vadd.f32 %v1154_v8, %v898_v10  ;;  %v1176_v31 = vadd.f32 %v1175_v9, %v899_v11  ;;  %v904_v9 = vmul.f32 %v1732_v41, %v112_v56  ;;  %v905_v10 = vmul.f32 %v1732_v41, %v113_v58  ;;  %v126_v41 = vld [vmem:[#allocation3 + $0x240] sm:$0xff] }
  0xe6   :  { %737 = vbcast.lane.b32.xlu1 %v1651_v16, 296  ;;  %v431_v12 = vpop.permute.xlu0 %430  ;;  %v1116_v24 = vadd.f32 %v1115_v62, %v872_v3 }
  0xe7   :  { %611 = vbcast.lane.b32.xlu0 %v1647_v14, 312  ;;  %v1156_v50 = vadd.f32 %v1155_v30, %v900_v27  ;;  %v1177_v51 = vadd.f32 %v1176_v31, %v901_v28  ;;  %v902_v52 = vmul.f32 %v431_v12, %v110_v36  ;;  %v903_v53 = vmul.f32 %v431_v12, %v111_v37  ;;  %v127_v31 = vld [vmem:[#allocation3 + $0x248] sm:$0xff] }
  0xe8   :  { %v1738_v26 = vpop.permute.xlu1 %442  ;;  %v1137_v27 = vadd.f32 %v1136_v63, %v873_v4  ;;  %v874_v28 = vmul.f32 %v1706_v1, %v82_v5  ;;  %v875_v30 = vmul.f32 %v1706_v1, %v83_v32 }
  0xe9   :  { %v1157_v11 = vadd.f32 %v1156_v50, %v902_v52  ;;  %v1178_v12 = vadd.f32 %v1177_v51, %v903_v53  ;;  %v909_v62 = vmul.f32 %v1738_v26, %v117_v43 }
  0xea   :  { %804 = vbcast.lane.b32.xlu1 %v1653_v17, 296  ;;  %v1744_v35 = vpop.permute.xlu0 %438  ;;  %v1117_v56 = vadd.f32 %v1116_v24, %v874_v28  ;;  %v1138_v58 = vadd.f32 %v1137_v27, %v875_v30  ;;  %v140_v24 = vld [vmem:[#allocation3 + $0x2b0] sm:$0xff]  ;;  %v141_v27 = vld [vmem:[#allocation3 + $0x2b8] sm:$0xff] }
  0xeb   :  { %678 = vbcast.lane.b32.xlu0 %v1649_v15, 312  ;;  %v906_v36 = vmul.f32 %v1744_v35, %v114_v13  ;;  %v907_v37 = vmul.f32 %v1744_v35, %v115_v18  ;;  %v1158_v34 = vadd.f32 %v1157_v11, %v904_v9  ;;  %v135_v13 = vld [vmem:[#allocation3 + $0x288] sm:$0xff] }
  0xec   :  { %v454_v23 = vpop.permute.xlu1 %453 }
  0xed   :  { %v912_v44 = vmul.f32 %v454_v23, %v120_v29  ;;  %v913_v45 = vmul.f32 %v454_v23, %v121_v33  ;;  %v84_v29 = vld [vmem:[#allocation3 + $0xf0] sm:$0xff]  ;;  %v85_v33 = vld [vmem:[#allocation3 + $0xf8] sm:$0xff] }
  0xee   :  { %741 = vbcast.lane.b32.xlu1 %v1651_v16, 304  ;;  %v450_v55 = vpop.permute.xlu0 %449  ;;  %v876_v35 = vmul.f32 %v1700_v54, %v84_v29 }
  0xef   :  { %v910_v59 = vmul.f32 %v450_v55, %v118_v38  ;;  %v911_v60 = vmul.f32 %v450_v55, %v119_v42  ;;  %615 = vbcast.lane.b32.xlu0 %v1647_v14, 320  ;;  %v116_v42 = vld [vmem:[#allocation3 + $0x1f0] sm:$0xff]  ;;  %v877_v55 = vmul.f32 %v1700_v54, %v85_v33  ;;  %v137_v54 = vld [vmem:[#allocation3 + $0x298] sm:$0xff] }
  0xf0   :  { %v462_v25 = vpop.permute.xlu1 %461  ;;  %v1118_v11 = vadd.f32 %v1117_v56, %v876_v35  ;;  %v142_v35 = vld [vmem:[#allocation3 + $0x2c0] sm:$0xff] }
  0xf1   :  { %v1188_v6 = vadd.f32 %v912_v44, %v910_v59  ;;  %v1209_v7 = vadd.f32 %v913_v45, %v911_v60  ;;  %v916_v20 = vmul.f32 %v462_v25, %v124_v57  ;;  %v917_v21 = vmul.f32 %v462_v25, %v125_v0  ;;  %v130_v59 = vld [vmem:[#allocation3 + $0x260] sm:$0xff]  ;;  %v131_v60 = vld [vmem:[#allocation3 + $0x268] sm:$0xff] }
  0xf2   :  { %808 = vbcast.lane.b32.xlu1 %v1653_v17, 304  ;;  %v458_v19 = vpop.permute.xlu0 %457  ;;  %v1179_v44 = vadd.f32 %v1178_v12, %v905_v10  ;;  %v1139_v12 = vadd.f32 %v1138_v58, %v877_v55  ;;  %v1119_v29 = vrot.slane %v1118_v11, 4  ;;  %v143_v55 = vld [vmem:[#allocation3 + $0x2c8] sm:$0xff] }
  0xf3   :  { %v914_v23 = vmul.f32 %v458_v19, %v122_v61  ;;  %v915_v46 = vmul.f32 %v458_v19, %v123_v2  ;;  %682 = vbcast.lane.b32.xlu0 %v1649_v15, 320  ;;  %v908_v61 = vmul.f32 %v1738_v26, %v116_v42  ;;  %v1159_v2 = vadd.f32 %v1158_v34, %v906_v36  ;;  %v134_v26 = vld [vmem:[#allocation3 + $0x280] sm:$0xff] }
  0xf4   :  { %v470_v8 = vpop.permute.xlu1 %469  ;;  %v1180_v3 = vadd.f32 %v1179_v44, %v907_v37  ;;  %v1140_v33 = vrot.slane %v1139_v12, 4  ;;  %v138_v36 = vld [vmem:[#allocation3 + $0x2a0] sm:$0xff]  ;;  %v139_v37 = vld [vmem:[#allocation3 + $0x2a8] sm:$0xff] }
  0xf5   :  { %v1189_v39 = vadd.f32 %v1188_v6, %v914_v23  ;;  %v1210_v40 = vadd.f32 %v1209_v7, %v915_v46  ;;  %v920_v45 = vmul.f32 %v470_v8, %v128_v49  ;;  %v921_v25 = vmul.f32 %v470_v8, %v129_v22  ;;  %v136_v6 = vld [vmem:[#allocation3 + $0x290] sm:$0xff] }
  0xf6   :  { %745 = vbcast.lane.b32.xlu1 %v1651_v16, 312  ;;  %v466_v1 = vpop.permute.xlu0 %465  ;;  %v1181_v49 = vadd.f32 %v1180_v3, %v909_v62 }
  0xf7   :  { %v1190_v50 = vadd.f32 %v1189_v39, %v916_v20  ;;  %v1211_v51 = vadd.f32 %v1210_v40, %v917_v21  ;;  %v918_v52 = vmul.f32 %v466_v1, %v126_v41  ;;  %v919_v53 = vmul.f32 %v466_v1, %v127_v31  ;;  %619 = vbcast.lane.b32.xlu0 %v1647_v14, 328  ;;  %v145_v1 = vld [vmem:[#allocation3 + $0x2d8] sm:$0xff] }
  0xf8   :  { %v478_v38 = vpop.permute.xlu1 %477  ;;  %v1160_v21 = vadd.f32 %v1159_v2, %v908_v61  ;;  %v1182_v43 = vrot.slane %v1181_v49, 4  ;;  %v149_v2 = vld [vmem:[#allocation3 + $0x2f8] sm:$0xff] }
  0xf9   :  { %v1191_v63 = vadd.f32 %v1190_v50, %v918_v52  ;;  %v1212_v57 = vadd.f32 %v1211_v51, %v919_v53  ;;  %v924_v4 = vmul.f32 %v478_v38, %v132_v47  ;;  %v925_v5 = vmul.f32 %v478_v38, %v133_v48 }
  0xfa   :  { %812 = vbcast.lane.b32.xlu1 %v1653_v17, 312  ;;  %v474_v32 = vpop.permute.xlu0 %473  ;;  %v1161_v42 = vrot.slane %v1160_v21, 4  ;;  %v1120_v52 = vadd.f32 %v1119_v29, %v1118_v11  ;;  %v1141_v53 = vadd.f32 %v1140_v33, %v1139_v12  ;;  %v1183_v61 = vadd.f32 %v1182_v43, %v1181_v49  ;;  %v156_v43 = vld [vmem:[#allocation3 + $0x330] sm:$0xff] }
  0xfb   :  { %v1192_v7 = vadd.f32 %v1191_v63, %v920_v45  ;;  %v1213_v8 = vadd.f32 %v1212_v57, %v921_v25  ;;  %v922_v9 = vmul.f32 %v474_v32, %v130_v59  ;;  %v923_v10 = vmul.f32 %v474_v32, %v131_v60  ;;  %686 = vbcast.lane.b32.xlu0 %v1649_v15, 328  ;;  %v144_v25 = vld [vmem:[#allocation3 + $0x2d0] sm:$0xff] }
  0xfc   :  { %v486_v0 = vpop.permute.xlu1 %485  ;;  %v1162_v60 = vadd.f32 %v1161_v42, %v1160_v21 }
  0xfd   :  { %v1193_v18 = vadd.f32 %v1192_v7, %v922_v9  ;;  %v1214_v19 = vadd.f32 %v1213_v8, %v923_v10  ;;  %v928_v22 = vmul.f32 %v486_v0, %v136_v6  ;;  %v929_v23 = vmul.f32 %v486_v0, %v137_v54  ;;  %v148_v0 = vld [vmem:[#allocation3 + $0x2f0] sm:$0xff]  ;;  %v146_v7 = vld [vmem:[#allocation3 + $0x2e0] sm:$0xff]  ;;  %v147_v8 = vld [vmem:[#allocation3 + $0x2e8] sm:$0xff] }
  0xfe   :  { %749 = vbcast.lane.b32.xlu1 %v1651_v16, 320  ;;  %v482_v46 = vpop.permute.xlu0 %481  ;;  %v1121_v6 = vrot.slane %v1120_v52, 2  ;;  %v1142_v54 = vrot.slane %v1141_v53, 2  ;;  %v1163_v12 = vrot.slane %v1162_v60, 2 }
  0xff   :  { %v1194_v28 = vadd.f32 %v1193_v18, %v924_v4  ;;  %v1215_v30 = vadd.f32 %v1214_v19, %v925_v5  ;;  %v926_v41 = vmul.f32 %v482_v46, %v134_v26  ;;  %v927_v31 = vmul.f32 %v482_v46, %v135_v13  ;;  %623 = vbcast.lane.b32.xlu0 %v1647_v14, 336  ;;  %v152_v19 = vld [vmem:[#allocation3 + $0x310] sm:$0xff] }
 0x100   :  { %v494_v20 = vpop.permute.xlu1 %493  ;;  %v1184_v26 = vrot.slane %v1183_v61, 2 }
 0x101   :  { %v1195_v39 = vadd.f32 %v1194_v28, %v926_v41  ;;  %v1216_v40 = vadd.f32 %v1215_v30, %v927_v31  ;;  %v932_v34 = vmul.f32 %v494_v20, %v140_v24  ;;  %v933_v44 = vmul.f32 %v494_v20, %v141_v27  ;;  %v153_v20 = vld [vmem:[#allocation3 + $0x318] sm:$0xff]  ;;  %v150_v28 = vld [vmem:[#allocation3 + $0x300] sm:$0xff]  ;;  %v151_v30 = vld [vmem:[#allocation3 + $0x308] sm:$0xff] }
 0x102   :  { %816 = vbcast.lane.b32.xlu1 %v1653_v17, 320  ;;  %v490_v45 = vpop.permute.xlu0 %489  ;;  %v1122_v24 = vadd.f32 %v1121_v6, %v1120_v52  ;;  %v1143_v27 = vadd.f32 %v1142_v54, %v1141_v53 }
 0x103   :  { %v1196_v47 = vadd.f32 %v1195_v39, %v928_v22  ;;  %v1217_v48 = vadd.f32 %v1216_v40, %v929_v23  ;;  %v930_v50 = vmul.f32 %v490_v45, %v138_v36  ;;  %v931_v51 = vmul.f32 %v490_v45, %v139_v37  ;;  %690 = vbcast.lane.b32.xlu0 %v1649_v15, 336 }
 0x104   :  { %v502_v38 = vpop.permute.xlu1 %501  ;;  %v1164_v37 = vadd.f32 %v1163_v12, %v1162_v60  ;;  %v1185_v39 = vadd.f32 %v1184_v26, %v1183_v61 }
 0x105   :  { %v1197_v56 = vadd.f32 %v1196_v47, %v930_v50  ;;  %v1218_v58 = vadd.f32 %v1217_v48, %v931_v51  ;;  %v936_v62 = vmul.f32 %v502_v38, %v144_v25  ;;  %v937_v63 = vmul.f32 %v502_v38, %v145_v1  ;;  %v154_v47 = vld [vmem:[#allocation3 + $0x320] sm:$0xff]  ;;  %v155_v48 = vld [vmem:[#allocation3 + $0x328] sm:$0xff] }
 0x106   :  { %753 = vbcast.lane.b32.xlu1 %v1651_v16, 328  ;;  %v498_v57 = vpop.permute.xlu0 %497  ;;  %v1123_v25 = vrot.slane %v1122_v24, 1  ;;  %v1144_v1 = vrot.slane %v1143_v27, 1 }
 0x107   :  { %v1198_v3 = vadd.f32 %v1197_v56, %v932_v34  ;;  %v1219_v4 = vadd.f32 %v1218_v58, %v933_v44  ;;  %v934_v5 = vmul.f32 %v498_v57, %v142_v35  ;;  %v935_v32 = vmul.f32 %v498_v57, %v143_v55  ;;  %627 = vbcast.lane.b32.xlu0 %v1647_v14, 344  ;;  %v157_v34 = vld [vmem:[#allocation3 + $0x338] sm:$0xff] }
 0x108   :  { %v510_v59 = vpop.permute.xlu1 %509  ;;  %v1165_v55 = vrot.slane %v1164_v37, 1  ;;  %v1186_v56 = vrot.slane %v1185_v39, 1 }
 0x109   :  { %v1199_v9 = vadd.f32 %v1198_v3, %v934_v5  ;;  %v1220_v10 = vadd.f32 %v1219_v4, %v935_v32  ;;  %v940_v13 = vmul.f32 %v510_v59, %v148_v0  ;;  %v941_v18 = vmul.f32 %v510_v59, %v149_v2  ;;  %v158_v0 = vld [vmem:[#allocation3 + $0x340] sm:$0xff]  ;;  %v160_v4 = vld [vmem:[#allocation3 + $0x350] sm:$0xff]  ;;  %v161_v5 = vld [vmem:[#allocation3 + $0x358] sm:$0xff] }
 0x10a   :  { %820 = vbcast.lane.b32.xlu1 %v1653_v17, 328  ;;  %v506_v21 = vpop.permute.xlu0 %505 }
 0x10b   :  { %v1200_v49 = vadd.f32 %v1199_v9, %v936_v62  ;;  %v1221_v22 = vadd.f32 %v1220_v10, %v937_v63  ;;  %v938_v23 = vmul.f32 %v506_v21, %v146_v7  ;;  %v939_v46 = vmul.f32 %v506_v21, %v147_v8  ;;  %694 = vbcast.lane.b32.xlu0 %v1649_v15, 344  ;;  %v159_v7 = vld [vmem:[#allocation3 + $0x348] sm:$0xff] }
 0x10c   :  { %v521_v11 = vpop.permute.xlu1 %520  ;;  %v1124_v8 = vadd.f32 %v1123_v25, %v1122_v24  ;;  %v1145_v9 = vadd.f32 %v1144_v1, %v1143_v27  ;;  %v1166_v10 = vadd.f32 %v1165_v55, %v1164_v37  ;;  %v166_v25 = vld [vmem:[#allocation3 + $0x380] sm:$0xff]  ;;  %v167_v1 = vld [vmem:[#allocation3 + $0x388] sm:$0xff] }
 0x10d   :  { %v944_v41 = vmul.f32 %v521_v11, %v152_v19  ;;  %v945_v31 = vmul.f32 %v521_v11, %v153_v20  ;;  %v1201_v29 = vadd.f32 %v1200_v49, %v938_v23  ;;  %v1222_v33 = vadd.f32 %v1221_v22, %v939_v46  ;;  %v162_v23 = vld [vmem:[#allocation3 + $0x360] sm:$0xff]  ;;  %v163_v46 = vld [vmem:[#allocation3 + $0x368] sm:$0xff] }
 0x10e   :  { %757 = vbcast.lane.b32.xlu1 %v1651_v16, 336  ;;  %v517_v40 = vpop.permute.xlu0 %516  ;;  %v1187_v11 = vadd.f32 %v1186_v56, %v1185_v39 }
 0x10f   :  { %v1202_v38 = vadd.f32 %v1201_v29, %v940_v13  ;;  %v1223_v42 = vadd.f32 %v1222_v33, %v941_v18  ;;  %v942_v44 = vmul.f32 %v517_v40, %v150_v28  ;;  %v943_v45 = vmul.f32 %v517_v40, %v151_v30  ;;  %631 = vbcast.lane.b32.xlu0 %v1647_v14, 352  ;;  %v164_v28 = vld [vmem:[#allocation3 + $0x370] sm:$0xff]  ;;  %v165_v30 = vld [vmem:[#allocation3 + $0x378] sm:$0xff] }
 0x110   :  { %v529_v36 = vpop.permute.xlu1 %528  ;;  %v1470_v29 = vsel %vm1456_vm1, %v1187_v11, %v1145_v9 }
 0x111   :  { %v1203_v50 = vrot.slane %v1202_v38, 4  ;;  %v1224_v51 = vrot.slane %v1223_v42, 4  ;;  %v1230_v52 = vadd.f32 %v944_v41, %v942_v44  ;;  %v1251_v53 = vadd.f32 %v945_v31, %v943_v45 }
 0x112   :  { %824 = vbcast.lane.b32.xlu1 %v1653_v17, 336  ;;  %v948_v58 = vmul.f32 %v529_v36, %v156_v43  ;;  %v949_v59 = vmul.f32 %v529_v36, %v157_v34  ;;  %v525_v60 = vpop.permute.xlu0 %524  ;;  %v1457_v31 = vsel %vm1456_vm1, %v1166_v10, %v1124_v8 }
 0x113   :  { %v1204_v61 = vadd.f32 %v1203_v50, %v1202_v38  ;;  %v1225_v62 = vadd.f32 %v1224_v51, %v1223_v42  ;;  %v946_v63 = vmul.f32 %v525_v60, %v154_v47  ;;  %v947_v57 = vmul.f32 %v525_v60, %v155_v48  ;;  %698 = vbcast.lane.b32.xlu0 %v1649_v15, 352  ;;  %v168_v50 = vld [vmem:[#allocation3 + $0x390] sm:$0xff]  ;;  %v169_v51 = vld [vmem:[#allocation3 + $0x398] sm:$0xff] }
 0x114   :  { %v537_v35 = vpop.permute.xlu1 %536 }
 0x115   :  { %v1205_v2 = vrot.slane %v1204_v61, 2  ;;  %v1226_v3 = vrot.slane %v1225_v62, 2  ;;  %v1231_v32 = vadd.f32 %v1230_v52, %v946_v63  ;;  %v1252_v6 = vadd.f32 %v1251_v53, %v947_v57  ;;  %v170_v63 = vld [vmem:[#allocation3 + $0x3a0] sm:$0xff]  ;;  %v171_v57 = vld [vmem:[#allocation3 + $0x3a8] sm:$0xff] }
 0x116   :  { %761 = vbcast.lane.b32.xlu1 %v1651_v16, 344  ;;  %v533_v12 = vpop.permute.xlu0 %532  ;;  %v952_v20 = vmul.f32 %v537_v35, %v160_v4  ;;  %v953_v21 = vmul.f32 %v537_v35, %v161_v5  ;;  %v1486_v4 = vld [vmem:[#allocation2] sm:$0xff] }
 0x117   :  { %v1206_v26 = vadd.f32 %v1205_v2, %v1204_v61  ;;  %v1227_v13 = vadd.f32 %v1226_v3, %v1225_v62  ;;  %v1232_v18 = vadd.f32 %v1231_v32, %v948_v58  ;;  %v1253_v19 = vadd.f32 %v1252_v6, %v949_v59  ;;  %635 = vbcast.lane.b32.xlu0 %v1647_v14, 360  ;;  %v173_v2 = vld [vmem:[#allocation3 + $0x3b8] sm:$0xff] }
 0x118   :  { %v545_v54 = vpop.permute.xlu1 %544  ;;  %v950_v49 = vmul.f32 %v533_v12, %v158_v0  ;;  %v951_v22 = vmul.f32 %v533_v12, %v159_v7  ;;  %v172_v0 = vld [vmem:[#allocation3 + $0x3b0] sm:$0xff]  ;;  %v174_v12 = vld [vmem:[#allocation3 + $0x3c0] sm:$0xff] }
 0x119   :  { %v1207_v24 = vrot.slane %v1206_v26, 1  ;;  %v1228_v27 = vrot.slane %v1227_v13, 1  ;;  %v956_v43 = vmul.f32 %v545_v54, %v164_v28  ;;  %v957_v34 = vmul.f32 %v545_v54, %v165_v30 }
 0x11a   :  { %828 = vbcast.lane.b32.xlu1 %v1653_v17, 344  ;;  %v1233_v33 = vadd.f32 %v1232_v18, %v950_v49  ;;  %v1254_v36 = vadd.f32 %v1253_v19, %v951_v22  ;;  %v541_v37 = vpop.permute.xlu0 %540  ;;  %v176_v18 = vld [vmem:[#allocation3 + $0x3d0] sm:$0xff]  ;;  %v177_v19 = vld [vmem:[#allocation3 + $0x3d8] sm:$0xff] }
 0x11b   :  { %v1208_v39 = vadd.f32 %v1207_v24, %v1206_v26  ;;  %v1229_v40 = vadd.f32 %v1228_v27, %v1227_v13  ;;  %v954_v38 = vmul.f32 %v541_v37, %v162_v23  ;;  %v955_v42 = vmul.f32 %v541_v37, %v163_v46  ;;  %702 = vbcast.lane.b32.xlu0 %v1649_v15, 360  ;;  %v175_v26 = vld [vmem:[#allocation3 + $0x3c8] sm:$0xff] }
 0x11c   :  { %v553_v41 = vpop.permute.xlu1 %552  ;;  %v1234_v44 = vadd.f32 %v1233_v33, %v952_v20  ;;  %v1255_v45 = vadd.f32 %v1254_v36, %v953_v21  ;;  %v1487_v13 = vmax.f32 %v1486_v4, 1e-09  ;;  %v181_v33 = vld [vmem:[#allocation3 + $0x3f8] sm:$0xff] }
 0x11d   :  { %v1789_v47 = vsel %vm1458_vm2, %v1208_v39, %v1457_v31  ;;  %v1792_v48 = vsel %vm1458_vm2, %v1229_v40, %v1470_v29  ;;  %v960_v59 = vmul.f32 %v553_v41, %v168_v50  ;;  %v961_v60 = vmul.f32 %v553_v41, %v169_v51  ;;  %v178_v41 = vld [vmem:[#allocation3 + $0x3e0] sm:$0xff]  ;;  %v179_v31 = vld [vmem:[#allocation3 + $0x3e8] sm:$0xff]  ;;  %v180_v29 = vld [vmem:[#allocation3 + $0x3f0] sm:$0xff] }
 0x11e   :  { %765 = vbcast.lane.b32.xlu1 %v1651_v16, 352  ;;  %v1235_v53 = vadd.f32 %v1234_v44, %v954_v38  ;;  %v1256_v35 = vadd.f32 %v1255_v45, %v955_v42  ;;  %v549_v55 = vpop.permute.xlu0 %548  ;;  %1525 = vrcp.f32 %v1487_v13  ;;  %v184_v40 = vld [vmem:[#allocation3 + $0x410] sm:$0xff]  ;;  %v185_v38 = vld [vmem:[#allocation3 + $0x418] sm:$0xff]  ;;  %v183_v50 = vld [vmem:[#allocation3 + $0x408] sm:$0xff] }
 0x11f   :  { %v958_v56 = vmul.f32 %v549_v55, %v166_v25  ;;  %v959_v58 = vmul.f32 %v549_v55, %v167_v1  ;;  %639 = vbcast.lane.b32.xlu0 %v1647_v14, 368  ;;  %v191_v13 = vld [vmem:[#allocation3 + $0x448] sm:$0xff] }
 0x120   :  { %v561_v52 = vpop.permute.xlu1 %560  ;;  %v1236_v61 = vadd.f32 %v1235_v53, %v956_v43  ;;  %v1257_v62 = vadd.f32 %v1256_v35, %v957_v34 }
 0x121   :  { %v964_v8 = vmul.f32 %v561_v52, %v172_v0  ;;  %v965_v9 = vmul.f32 %v561_v52, %v173_v2 }
 0x122   :  { %832 = vbcast.lane.b32.xlu1 %v1653_v17, 352  ;;  %v1237_v5 = vadd.f32 %v1236_v61, %v958_v56  ;;  %v1258_v32 = vadd.f32 %v1257_v62, %v959_v58  ;;  %v557_v6 = vpop.permute.xlu0 %556 }
 0x123   :  { %v962_v54 = vmul.f32 %v557_v6, %v170_v63  ;;  %v963_v7 = vmul.f32 %v557_v6, %v171_v57  ;;  %706 = vbcast.lane.b32.xlu0 %v1649_v15, 368  ;;  %v188_v63 = vld [vmem:[#allocation3 + $0x430] sm:$0xff]  ;;  %v189_v57 = vld [vmem:[#allocation3 + $0x438] sm:$0xff] }
 0x124   :  { %v569_v3 = vpop.permute.xlu1 %568  ;;  %v1238_v10 = vadd.f32 %v1237_v5, %v960_v59  ;;  %v1259_v11 = vadd.f32 %v1258_v32, %v961_v60  ;;  %v186_v60 = vld [vmem:[#allocation3 + $0x420] sm:$0xff] }
 0x125   :  { %v968_v24 = vmul.f32 %v569_v3, %v176_v18  ;;  %v969_v27 = vmul.f32 %v569_v3, %v177_v19 }
 0x126   :  { %769 = vbcast.lane.b32.xlu1 %v1651_v16, 360  ;;  %v1239_v21 = vadd.f32 %v1238_v10, %v962_v54  ;;  %v1260_v49 = vadd.f32 %v1259_v11, %v963_v7  ;;  %v565_v22 = vpop.permute.xlu0 %564 }
 0x127   :  { %v966_v23 = vmul.f32 %v565_v22, %v174_v12  ;;  %v967_v46 = vmul.f32 %v565_v22, %v175_v26  ;;  %643 = vbcast.lane.b32.xlu0 %v1647_v14, 376  ;;  %v182_v14 = vld [vmem:[#allocation3 + $0x400] sm:$0xff] }
 0x128   :  { %v577_v20 = vpop.permute.xlu1 %576  ;;  %v1240_v28 = vadd.f32 %v1239_v21, %v964_v8  ;;  %v1261_v30 = vadd.f32 %v1260_v49, %v965_v9  ;;  %v1526_v6 = vpop.eup %1525  ;;  %v192_v8 = vld [vmem:[#allocation3 + $0x450] sm:$0xff]  ;;  %v193_v9 = vld [vmem:[#allocation3 + $0x458] sm:$0xff] }
 0x129   :  { %v972_v44 = vmul.f32 %v577_v20, %v180_v29  ;;  %v973_v45 = vmul.f32 %v577_v20, %v181_v33  ;;  %v195_v29 = vld [vmem:[#allocation3 + $0x468] sm:$0xff] }
 0x12a   :  { %836 = vbcast.lane.b32.xlu1 %v1653_v17, 360  ;;  %v1241_v37 = vadd.f32 %v1240_v28, %v966_v23  ;;  %v1262_v39 = vadd.f32 %v1261_v30, %v967_v46  ;;  %v573_v42 = vpop.permute.xlu0 %572 }
 0x12b   :  { %v970_v43 = vmul.f32 %v573_v42, %v178_v41  ;;  %v971_v34 = vmul.f32 %v573_v42, %v179_v31  ;;  %710 = vbcast.lane.b32.xlu0 %v1649_v15, 376  ;;  %v187_v15 = vld [vmem:[#allocation3 + $0x428] sm:$0xff]  ;;  %v214_v42 = vld [vmem:[#allocation3 + $0x500] sm:$0xff] }
 0x12c   :  { %v588_v36 = vpop.permute.xlu1 %587  ;;  %v1242_v25 = vadd.f32 %v1241_v37, %v968_v24  ;;  %v1263_v1 = vadd.f32 %v1262_v39, %v969_v27 }
 0x12d   :  { %v976_v51 = vmul.f32 %v588_v36, %v184_v40  ;;  %v977_v52 = vmul.f32 %v588_v36, %v185_v38 }
 0x12e   :  { %773 = vbcast.lane.b32.xlu1 %v1651_v16, 368  ;;  %v1243_v35 = vadd.f32 %v1242_v25, %v970_v43  ;;  %v1264_v55 = vadd.f32 %v1263_v1, %v971_v34  ;;  %v584_v56 = vpop.permute.xlu0 %583  ;;  %v215_v43 = vld [vmem:[#allocation3 + $0x508] sm:$0xff]  ;;  %v218_v1 = vld [vmem:[#allocation3 + $0x520] sm:$0xff] }
 0x12f   :  { %v974_v58 = vmul.f32 %v584_v56, %v182_v14  ;;  %v975_v59 = vmul.f32 %v584_v56, %v183_v50  ;;  %777 = vbcast.lane.b32.xlu0 %v1651_v16, 376  ;;  %v190_v16 = vld [vmem:[#allocation3 + $0x440] sm:$0xff] }
 0x130   :  { %v596_v53 = vpop.permute.xlu1 %595  ;;  %v1244_v61 = vadd.f32 %v1243_v35, %v972_v44  ;;  %v1265_v62 = vadd.f32 %v1264_v55, %v973_v45 }
 0x131   :  { %v1272_v0 = vadd.f32 %v976_v51, %v974_v58  ;;  %v1293_v2 = vadd.f32 %v977_v52, %v975_v59  ;;  %v980_v54 = vmul.f32 %v596_v53, %v188_v63  ;;  %v981_v7 = vmul.f32 %v596_v53, %v189_v57  ;;  %v219_v51 = vld [vmem:[#allocation3 + $0x528] sm:$0xff]  ;;  %v216_v52 = vld [vmem:[#allocation3 + $0x510] sm:$0xff]  ;;  %v217_v53 = vld [vmem:[#allocation3 + $0x518] sm:$0xff] }
 0x132   :  { %840 = vbcast.lane.b32.xlu1 %v1653_v17, 368  ;;  %v1245_v4 = vrot.slane %v1244_v61, 4  ;;  %v1266_v5 = vrot.slane %v1265_v62, 4  ;;  %v592_v32 = vpop.permute.xlu0 %591  ;;  %v246_v63 = vld [vmem:[#allocation3 + $0x600] sm:$0xff]  ;;  %v247_v57 = vld [vmem:[#allocation3 + $0x608] sm:$0xff] }
 0x133   :  { %v978_v10 = vmul.f32 %v592_v32, %v186_v60  ;;  %v979_v11 = vmul.f32 %v592_v32, %v187_v15  ;;  %1494 = vperm.xlu0 %1524, %v1526_v6  }
 0x134   :  { %v604_v3 = vpop.permute.xlu1 %603  ;;  %v1246_v12 = vadd.f32 %v1245_v4, %v1244_v61  ;;  %v1267_v26 = vadd.f32 %v1266_v5, %v1265_v62  ;;  %v248_v4 = vld [vmem:[#allocation3 + $0x610] sm:$0xff]  ;;  %v249_v5 = vld [vmem:[#allocation3 + $0x618] sm:$0xff] }
 0x135   :  { %v1273_v18 = vadd.f32 %v1272_v0, %v978_v10  ;;  %v1294_v19 = vadd.f32 %v1293_v2, %v979_v11  ;;  %v984_v22 = vmul.f32 %v604_v3, %v192_v8  ;;  %v985_v23 = vmul.f32 %v604_v3, %v193_v9  ;;  %v280_v8 = vld [vmem:[#allocation3 + $0x710] sm:$0xff]  ;;  %v281_v9 = vld [vmem:[#allocation3 + $0x718] sm:$0xff] }
 0x136   :  { %844 = vbcast.lane.b32.xlu1 %v1653_v17, 376  ;;  %v1247_v21 = vrot.slane %v1246_v12, 2  ;;  %v1268_v49 = vrot.slane %v1267_v26, 2  ;;  %v600_v46 = vpop.permute.xlu0 %599  ;;  %v194_v17 = vld [vmem:[#allocation3 + $0x460] sm:$0xff] }
 0x137   :  { %v1274_v24 = vadd.f32 %v1273_v18, %v980_v54  ;;  %v1295_v27 = vadd.f32 %v1294_v19, %v981_v7  ;;  %v982_v28 = vmul.f32 %v600_v46, %v190_v16  ;;  %v983_v30 = vmul.f32 %v600_v46, %v191_v13  ;;  %v278_v18 = vld [vmem:[#allocation3 + $0x700] sm:$0xff]  ;;  %v279_v19 = vld [vmem:[#allocation3 + $0x708] sm:$0xff] }
 0x138   :  { %v651_v20 = vpop.permute.xlu1 %650  ;;  %v1248_v41 = vadd.f32 %v1247_v21, %v1246_v12  ;;  %v1269_v31 = vadd.f32 %v1268_v49, %v1267_v26  ;;  %v220_v12 = vld [vmem:[#allocation3 + $0x530] sm:$0xff]  ;;  %v221_v26 = vld [vmem:[#allocation3 + $0x538] sm:$0xff] }
 0x139   :  { %v1275_v33 = vadd.f32 %v1274_v24, %v982_v28  ;;  %v1296_v36 = vadd.f32 %v1295_v27, %v983_v30  ;;  %v1006_v60 = vmul.f32 %v651_v20, %v214_v42  ;;  %v1007_v61 = vmul.f32 %v651_v20, %v215_v43 }
 0x13a   :  { %v1249_v39 = vrot.slane %v1248_v41, 1  ;;  %v1270_v40 = vrot.slane %v1269_v31, 1  ;;  %v608_v38 = vpop.permute.xlu0 %607 }
 0x13b   :  { %v1276_v34 = vadd.f32 %v1275_v33, %v984_v22  ;;  %v1297_v44 = vadd.f32 %v1296_v36, %v985_v23  ;;  %v986_v45 = vmul.f32 %v608_v38, %v194_v17  ;;  %v987_v25 = vmul.f32 %v608_v38, %v195_v29  ;;  %v253_v29 = vld [vmem:[#allocation3 + $0x638] sm:$0xff]  ;;  %v250_v33 = vld [vmem:[#allocation3 + $0x620] sm:$0xff]  ;;  %v251_v36 = vld [vmem:[#allocation3 + $0x628] sm:$0xff] }
 0x13c   :  { %v718_v37 = vpop.permute.xlu1 %717  ;;  %v1250_v14 = vadd.f32 %v1249_v39, %v1248_v41  ;;  %v1271_v50 = vadd.f32 %v1270_v40, %v1269_v31  ;;  %v252_v41 = vld [vmem:[#allocation3 + $0x630] sm:$0xff] }
 0x13d   :  { %v1805_v35 = vadd.f32 %v1276_v34, %v986_v45  ;;  %v1807_v55 = vadd.f32 %v1297_v44, %v987_v25  ;;  %v1039_v7 = vmul.f32 %v718_v37, %v247_v57  ;;  %v284_v45 = vld [vmem:[#allocation3 + $0x730] sm:$0xff]  ;;  %v285_v25 = vld [vmem:[#allocation3 + $0x738] sm:$0xff] }
 0x13e   :  { %v1811_v58 = vsel %vm1460_vm3, %v1250_v14, %v1789_v47  ;;  %v1815_v59 = vsel %vm1460_vm3, %v1271_v50, %v1792_v48  ;;  %v655_v62 = vpop.permute.xlu0 %654  ;;  %v1038_v47 = vmul.f32 %v718_v37, %v246_v63  ;;  %v283_v14 = vld [vmem:[#allocation3 + $0x728] sm:$0xff] }
 0x13f   :  { %v1008_v2 = vmul.f32 %v655_v62, %v216_v52  ;;  %v1009_v3 = vmul.f32 %v655_v62, %v217_v53 }
 0x140   :  { %v659_v56 = vpop.permute.xlu1 %658 }
 0x141   :  { %v1010_v15 = vmul.f32 %v659_v56, %v218_v1  ;;  %v1011_v0 = vmul.f32 %v659_v56, %v219_v51  ;;  %v1314_v32 = vadd.f32 %v1008_v2, %v1006_v60  ;;  %v1335_v6 = vadd.f32 %v1009_v3, %v1007_v61  ;;  %v282_v1 = vld [vmem:[#allocation3 + $0x720] sm:$0xff] }
 0x142   :  { %v722_v48 = vpop.permute.xlu0 %721 }
 0x143   :  { %v1040_v10 = vmul.f32 %v722_v48, %v248_v4  ;;  %v1041_v11 = vmul.f32 %v722_v48, %v249_v5  ;;  %v1315_v16 = vadd.f32 %v1314_v32, %v1010_v15  ;;  %v1336_v13 = vadd.f32 %v1335_v6, %v1011_v0  ;;  %v222_v15 = vld [vmem:[#allocation3 + $0x540] sm:$0xff]  ;;  %v223_v0 = vld [vmem:[#allocation3 + $0x548] sm:$0xff] }
 0x144   :  { %v789_v54 = vpop.permute.xlu1 %788 }
 0x145   :  { %v1072_v20 = vmul.f32 %v789_v54, %v280_v8  ;;  %v1073_v21 = vmul.f32 %v789_v54, %v281_v9  ;;  %v1356_v49 = vadd.f32 %v1040_v10, %v1038_v47  ;;  %v1377_v22 = vadd.f32 %v1041_v11, %v1039_v7 }
 0x146   :  { %v785_v27 = vpop.permute.xlu0 %784 }
 0x147   :  { %v1070_v28 = vmul.f32 %v785_v27, %v278_v18  ;;  %v1071_v30 = vmul.f32 %v785_v27, %v279_v19 }
 0x148   :  { %v663_v23 = vpop.permute.xlu1 %662 }
 0x149   :  { %v1012_v46 = vmul.f32 %v663_v23, %v220_v12  ;;  %v1013_v24 = vmul.f32 %v663_v23, %v221_v26  ;;  %v1398_v37 = vadd.f32 %v1072_v20, %v1070_v28  ;;  %v1419_v39 = vadd.f32 %v1073_v21, %v1071_v30  ;;  %v254_v28 = vld [vmem:[#allocation3 + $0x640] sm:$0xff]  ;;  %v255_v30 = vld [vmem:[#allocation3 + $0x648] sm:$0xff] }
 0x14a   :  { %v726_v38 = vpop.permute.xlu0 %725 }
 0x14b   :  { %v1316_v31 = vadd.f32 %v1315_v16, %v1012_v46  ;;  %v1337_v17 = vadd.f32 %v1336_v13, %v1013_v24  ;;  %v1042_v34 = vmul.f32 %v726_v38, %v250_v33  ;;  %v1043_v44 = vmul.f32 %v726_v38, %v251_v36  ;;  %v225_v38 = vld [vmem:[#allocation3 + $0x558] sm:$0xff] }
 0x14c   :  { %v730_v40 = vpop.permute.xlu1 %729 }
 0x14d   :  { %v1044_v42 = vmul.f32 %v730_v40, %v252_v41  ;;  %v1045_v43 = vmul.f32 %v730_v40, %v253_v29  ;;  %v1357_v50 = vadd.f32 %v1356_v49, %v1042_v34  ;;  %v1378_v51 = vadd.f32 %v1377_v22, %v1043_v44  ;;  %v257_v40 = vld [vmem:[#allocation3 + $0x658] sm:$0xff] }
 0x14e   :  { %v793_v60 = vpop.permute.xlu0 %792 }
 0x14f   :  { %v1074_v61 = vmul.f32 %v793_v60, %v282_v1  ;;  %v1075_v62 = vmul.f32 %v793_v60, %v283_v14  ;;  %v1358_v63 = vadd.f32 %v1357_v50, %v1044_v42  ;;  %v1379_v57 = vadd.f32 %v1378_v51, %v1045_v43  ;;  %v288_v42 = vld [vmem:[#allocation3 + $0x750] sm:$0xff]  ;;  %v289_v43 = vld [vmem:[#allocation3 + $0x758] sm:$0xff]  ;;  %v259_v1 = vld [vmem:[#allocation3 + $0x668] sm:$0xff] }
 0x150   :  { %v797_v52 = vpop.permute.xlu1 %796  ;;  %v227_v60 = vld [vmem:[#allocation3 + $0x568] sm:$0xff] }
 0x151   :  { %v1076_v53 = vmul.f32 %v797_v52, %v284_v45  ;;  %v1077_v56 = vmul.f32 %v797_v52, %v285_v25  ;;  %v1399_v2 = vadd.f32 %v1398_v37, %v1074_v61  ;;  %v1420_v3 = vadd.f32 %v1419_v39, %v1075_v62  ;;  %v224_v37 = vld [vmem:[#allocation3 + $0x550] sm:$0xff]  ;;  %v258_v25 = vld [vmem:[#allocation3 + $0x660] sm:$0xff] }
 0x152   :  { %v667_v5 = vpop.permute.xlu0 %666  ;;  %v256_v39 = vld [vmem:[#allocation3 + $0x650] sm:$0xff] }
 0x153   :  { %v1014_v32 = vmul.f32 %v667_v5, %v222_v15  ;;  %v1015_v6 = vmul.f32 %v667_v5, %v223_v0  ;;  %v1400_v54 = vadd.f32 %v1399_v2, %v1076_v53  ;;  %v1421_v47 = vadd.f32 %v1420_v3, %v1077_v56  ;;  %v226_v56 = vld [vmem:[#allocation3 + $0x560] sm:$0xff]  ;;  %v291_v3 = vld [vmem:[#allocation3 + $0x768] sm:$0xff] }
 0x154   :  { %v671_v4 = vpop.permute.xlu1 %670  ;;  %v290_v2 = vld [vmem:[#allocation3 + $0x760] sm:$0xff] }
 0x155   :  { %v1817_v7 = vadd.f32 %v1316_v31, %v1014_v32  ;;  %v1819_v8 = vadd.f32 %v1337_v17, %v1015_v6  ;;  %v286_v31 = vld [vmem:[#allocation3 + $0x740] sm:$0xff]  ;;  %v287_v17 = vld [vmem:[#allocation3 + $0x748] sm:$0xff]  ;;  %v1016_v61 = vmul.f32 %v671_v4, %v224_v37  ;;  %v1017_v62 = vmul.f32 %v671_v4, %v225_v38 }
 0x156   :  { %v734_v48 = vpop.permute.xlu0 %733 }
 0x157   :  { %v1046_v33 = vmul.f32 %v734_v48, %v254_v28  ;;  %v1047_v36 = vmul.f32 %v734_v48, %v255_v30  ;;  %v197_v28 = vld [vmem:[#allocation3 + $0x478] sm:$0xff]  ;;  %v1318_v37 = vadd.f32 %v1817_v7, %v1016_v61 }
 0x158   :  { %v738_v9 = vpop.permute.xlu1 %737 }
 0x159   :  { %v1048_v50 = vmul.f32 %v738_v9, %v256_v39  ;;  %v1049_v51 = vmul.f32 %v738_v9, %v257_v40  ;;  %v1359_v52 = vadd.f32 %v1358_v63, %v1046_v33  ;;  %v1380_v53 = vadd.f32 %v1379_v57, %v1047_v36  ;;  %v260_v36 = vld [vmem:[#allocation3 + $0x670] sm:$0xff]  ;;  %v229_v40 = vld [vmem:[#allocation3 + $0x578] sm:$0xff] }
 0x15a   :  { %v801_v11 = vpop.permute.xlu0 %800  ;;  %v228_v39 = vld [vmem:[#allocation3 + $0x570] sm:$0xff] }
 0x15b   :  { %v1078_v34 = vmul.f32 %v801_v11, %v286_v31  ;;  %v1079_v44 = vmul.f32 %v801_v11, %v287_v17  ;;  %v196_v11 = vld [vmem:[#allocation3 + $0x470] sm:$0xff]  ;;  %v1360_v57 = vadd.f32 %v1359_v52, %v1048_v50  ;;  %v1381_v17 = vadd.f32 %v1380_v53, %v1049_v51  ;;  %v262_v52 = vld [vmem:[#allocation3 + $0x680] sm:$0xff] }
 0x15c   :  { %v805_v10 = vpop.permute.xlu1 %804 }
 0x15d   :  { %v1080_v15 = vmul.f32 %v805_v10, %v288_v42  ;;  %v1081_v0 = vmul.f32 %v805_v10, %v289_v43  ;;  %v1401_v5 = vadd.f32 %v1400_v54, %v1078_v34  ;;  %v1422_v32 = vadd.f32 %v1421_v47, %v1079_v44  ;;  %v261_v10 = vld [vmem:[#allocation3 + $0x678] sm:$0xff]  ;;  %v292_v34 = vld [vmem:[#allocation3 + $0x770] sm:$0xff] }
 0x15e   :  { %v675_v26 = vpop.permute.xlu0 %674  ;;  %v1339_v54 = vadd.f32 %v1819_v8, %v1017_v62  ;;  %v293_v44 = vld [vmem:[#allocation3 + $0x778] sm:$0xff]  ;;  %v199_v8 = vld [vmem:[#allocation3 + $0x488] sm:$0xff] }
 0x15f   :  { %v1018_v31 = vmul.f32 %v675_v26, %v226_v56  ;;  %v1019_v9 = vmul.f32 %v675_v26, %v227_v60  ;;  %v1402_v43 = vadd.f32 %v1401_v5, %v1080_v15  ;;  %v1423_v26 = vadd.f32 %v1422_v32, %v1081_v0  ;;  %v230_v15 = vld [vmem:[#allocation3 + $0x580] sm:$0xff]  ;;  %v231_v0 = vld [vmem:[#allocation3 + $0x588] sm:$0xff] }
 0x160   :  { %v742_v12 = vpop.permute.xlu1 %741  ;;  %v294_v32 = vld [vmem:[#allocation3 + $0x780] sm:$0xff] }
 0x161   :  { %v1050_v6 = vmul.f32 %v742_v12, %v258_v25  ;;  %v1051_v48 = vmul.f32 %v742_v12, %v259_v1  ;;  %v198_v25 = vld [vmem:[#allocation3 + $0x480] sm:$0xff]  ;;  %v1340_v50 = vadd.f32 %v1339_v54, %v1019_v9  ;;  %v201_v9 = vld [vmem:[#allocation3 + $0x498] sm:$0xff] }
 0x162   :  { %v612_v13 = vpop.permute.xlu0 %611 }
 0x163   :  { %v988_v47 = vmul.f32 %v612_v13, %v196_v11  ;;  %v989_v12 = vmul.f32 %v612_v13, %v197_v28  ;;  %v1361_v38 = vadd.f32 %v1360_v57, %v1050_v6  ;;  %v1382_v42 = vadd.f32 %v1381_v17, %v1051_v48  ;;  %v263_v13 = vld [vmem:[#allocation3 + $0x688] sm:$0xff] }
 0x164   :  { %v809_v16 = vpop.permute.xlu1 %808  ;;  %v295_v6 = vld [vmem:[#allocation3 + $0x788] sm:$0xff] }
 0x165   :  { %v1082_v33 = vmul.f32 %v809_v16, %v290_v2  ;;  %v1083_v4 = vmul.f32 %v809_v16, %v291_v3  ;;  %v1319_v16 = vadd.f32 %v1318_v37, %v1018_v31  ;;  %v1278_v2 = vadd.f32 %v1805_v35, %v988_v47  ;;  %v200_v31 = vld [vmem:[#allocation3 + $0x490] sm:$0xff] }
 0x166   :  { %v1823_v19 = vpop.permute.xlu0 %678  ;;  %v1299_v3 = vadd.f32 %v1807_v55, %v989_v12  ;;  %v264_v37 = vld [vmem:[#allocation3 + $0x690] sm:$0xff] }
 0x167   :  { %v1403_v56 = vadd.f32 %v1402_v43, %v1082_v33  ;;  %v1424_v60 = vadd.f32 %v1423_v26, %v1083_v4  ;;  %v1020_v61 = vmul.f32 %v1823_v19, %v228_v39  ;;  %v1021_v62 = vmul.f32 %v1823_v19, %v229_v40  ;;  %v232_v40 = vld [vmem:[#allocation3 + $0x590] sm:$0xff] }
 0x168   :  { %v1821_v18 = vpop.permute.xlu1 %745 }
 0x169   :  { %v1052_v51 = vmul.f32 %v1821_v18, %v260_v36  ;;  %v1053_v7 = vmul.f32 %v1821_v18, %v261_v10  ;;  %v1320_v4 = vadd.f32 %v1319_v16, %v1020_v61  ;;  %v1341_v36 = vadd.f32 %v1340_v50, %v1021_v62 }
 0x16a   :  { %v1827_v21 = vpop.permute.xlu0 %615 }
 0x16b   :  { %v990_v48 = vmul.f32 %v1827_v21, %v198_v25  ;;  %v991_v11 = vmul.f32 %v1827_v21, %v199_v8  ;;  %v1362_v35 = vadd.f32 %v1361_v38, %v1052_v51  ;;  %v1383_v55 = vadd.f32 %v1382_v42, %v1053_v7  ;;  %v233_v38 = vld [vmem:[#allocation3 + $0x598] sm:$0xff]  ;;  %v202_v25 = vld [vmem:[#allocation3 + $0x4a0] sm:$0xff]  ;;  %v203_v8 = vld [vmem:[#allocation3 + $0x4a8] sm:$0xff] }
 0x16c   :  { %v1825_v20 = vpop.permute.xlu1 %812 }
 0x16d   :  { %v1084_v5 = vmul.f32 %v1825_v20, %v292_v34  ;;  %v1085_v18 = vmul.f32 %v1825_v20, %v293_v44  ;;  %v1279_v42 = vadd.f32 %v1278_v2, %v990_v48  ;;  %v296_v34 = vld [vmem:[#allocation3 + $0x790] sm:$0xff]  ;;  %v297_v44 = vld [vmem:[#allocation3 + $0x798] sm:$0xff] }
 0x16e   :  { %v1831_v22 = vpop.permute.xlu0 %682 }
 0x16f   :  { %v1022_v17 = vmul.f32 %v1831_v22, %v230_v15  ;;  %v1023_v20 = vmul.f32 %v1831_v22, %v231_v0  ;;  %v1404_v54 = vadd.f32 %v1403_v56, %v1084_v5  ;;  %v1425_v47 = vadd.f32 %v1424_v60, %v1085_v18  ;;  %v234_v15 = vld [vmem:[#allocation3 + $0x5a0] sm:$0xff]  ;;  %v235_v0 = vld [vmem:[#allocation3 + $0x5a8] sm:$0xff] }
 0x170   :  { %v1829_v49 = vpop.permute.xlu1 %749  ;;  %v1300_v22 = vadd.f32 %v1299_v3, %v991_v11 }
 0x171   :  { %v1054_v28 = vmul.f32 %v1829_v49, %v262_v52  ;;  %v1055_v19 = vmul.f32 %v1829_v49, %v263_v13  ;;  %v265_v49 = vld [vmem:[#allocation3 + $0x698] sm:$0xff]  ;;  %v1342_v50 = vadd.f32 %v1341_v36, %v1023_v20  ;;  %v266_v52 = vld [vmem:[#allocation3 + $0x6a0] sm:$0xff] }
 0x172   :  { %v1835_v46 = vpop.permute.xlu0 %619 }
 0x173   :  { %v992_v12 = vmul.f32 %v1835_v46, %v200_v31  ;;  %v993_v39 = vmul.f32 %v1835_v46, %v201_v9  ;;  %v1363_v43 = vadd.f32 %v1362_v35, %v1054_v28  ;;  %v1384_v26 = vadd.f32 %v1383_v55, %v1055_v19  ;;  %v267_v46 = vld [vmem:[#allocation3 + $0x6a8] sm:$0xff]  ;;  %v204_v19 = vld [vmem:[#allocation3 + $0x4b0] sm:$0xff] }
 0x174   :  { %v1833_v23 = vpop.permute.xlu1 %816 }
 0x175   :  { %v1086_v21 = vmul.f32 %v1833_v23, %v294_v32  ;;  %v1087_v10 = vmul.f32 %v1833_v23, %v295_v6  ;;  %v1321_v23 = vadd.f32 %v1320_v4, %v1022_v17  ;;  %v1280_v2 = vadd.f32 %v1279_v42, %v992_v12  ;;  %v299_v32 = vld [vmem:[#allocation3 + $0x7a8] sm:$0xff]  ;;  %v237_v12 = vld [vmem:[#allocation3 + $0x5b8] sm:$0xff]  ;;  %v300_v42 = vld [vmem:[#allocation3 + $0x7b0] sm:$0xff] }
 0x176   :  { %v1839_v27 = vpop.permute.xlu0 %686  ;;  %v1301_v3 = vadd.f32 %v1300_v22, %v993_v39  ;;  %v301_v22 = vld [vmem:[#allocation3 + $0x7b8] sm:$0xff] }
 0x177   :  { %v1405_v56 = vadd.f32 %v1404_v54, %v1086_v21  ;;  %v1426_v60 = vadd.f32 %v1425_v47, %v1087_v10  ;;  %v1024_v61 = vmul.f32 %v1839_v27, %v232_v40  ;;  %v1025_v62 = vmul.f32 %v1839_v27, %v233_v38  ;;  %v205_v27 = vld [vmem:[#allocation3 + $0x4b8] sm:$0xff]  ;;  %v268_v21 = vld [vmem:[#allocation3 + $0x6b0] sm:$0xff] }
 0x178   :  { %v1837_v24 = vpop.permute.xlu1 %753  ;;  %v269_v10 = vld [vmem:[#allocation3 + $0x6b8] sm:$0xff]  ;;  %v236_v47 = vld [vmem:[#allocation3 + $0x5b0] sm:$0xff] }
 0x179   :  { %v1056_v51 = vmul.f32 %v1837_v24, %v264_v37  ;;  %v1057_v7 = vmul.f32 %v1837_v24, %v265_v49  ;;  %v298_v24 = vld [vmem:[#allocation3 + $0x7a0] sm:$0xff]  ;;  %v1322_v20 = vadd.f32 %v1321_v23, %v1024_v61  ;;  %v1343_v4 = vadd.f32 %v1342_v50, %v1025_v62  ;;  %v207_v23 = vld [vmem:[#allocation3 + $0x4c8] sm:$0xff] }
 0x17a   :  { %v1843_v29 = vpop.permute.xlu0 %623  ;;  %v270_v50 = vld [vmem:[#allocation3 + $0x6c0] sm:$0xff] }
 0x17b   :  { %v994_v6 = vmul.f32 %v1843_v29, %v202_v25  ;;  %v995_v48 = vmul.f32 %v1843_v29, %v203_v8  ;;  %v1364_v9 = vadd.f32 %v1363_v43, %v1056_v51  ;;  %v1385_v35 = vadd.f32 %v1384_v26, %v1057_v7  ;;  %v206_v43 = vld [vmem:[#allocation3 + $0x4c0] sm:$0xff] }
 0x17c   :  { %v1841_v41 = vpop.permute.xlu1 %820 }
 0x17d   :  { %v1088_v5 = vmul.f32 %v1841_v41, %v296_v34  ;;  %v1089_v18 = vmul.f32 %v1841_v41, %v297_v44  ;;  %v1281_v39 = vadd.f32 %v1280_v2, %v994_v6  ;;  %v1302_v40 = vadd.f32 %v1301_v3, %v995_v48  ;;  %v302_v2 = vld [vmem:[#allocation3 + $0x7c0] sm:$0xff] }
 0x17e   :  { %v1847_v14 = vpop.permute.xlu0 %690 }
 0x17f   :  { %v1026_v55 = vmul.f32 %v1847_v14, %v234_v15  ;;  %v1027_v17 = vmul.f32 %v1847_v14, %v235_v0  ;;  %v1406_v37 = vadd.f32 %v1405_v56, %v1088_v5  ;;  %v238_v56 = vld [vmem:[#allocation3 + $0x5c0] sm:$0xff] }
 0x180   :  { %v1845_v45 = vpop.permute.xlu1 %757 }
 0x181   :  { %v1058_v11 = vmul.f32 %v1845_v45, %v266_v52  ;;  %v1059_v28 = vmul.f32 %v1845_v45, %v267_v46  ;;  %v1427_v45 = vadd.f32 %v1426_v60, %v1089_v18  ;;  %v1344_v34 = vadd.f32 %v1343_v4, %v1027_v17  ;;  %v239_v60 = vld [vmem:[#allocation3 + $0x5c8] sm:$0xff]  ;;  %v240_v17 = vld [vmem:[#allocation3 + $0x5d0] sm:$0xff] }
 0x182   :  { %v1851_v63 = vpop.permute.xlu0 %627 }
 0x183   :  { %v996_v49 = vmul.f32 %v1851_v63, %v204_v19  ;;  %v997_v54 = vmul.f32 %v1851_v63, %v205_v27  ;;  %v1365_v14 = vadd.f32 %v1364_v9, %v1058_v11  ;;  %v1386_v38 = vadd.f32 %v1385_v35, %v1059_v28  ;;  %v271_v63 = vld [vmem:[#allocation3 + $0x6c8] sm:$0xff] }
 0x184   :  { %v1849_v30 = vpop.permute.xlu1 %824 }
 0x185   :  { %v1090_v36 = vmul.f32 %v1849_v30, %v298_v24  ;;  %v1091_v29 = vmul.f32 %v1849_v30, %v299_v32  ;;  %v1323_v30 = vadd.f32 %v1322_v20, %v1026_v55  ;;  %v1282_v61 = vadd.f32 %v1281_v39, %v996_v49  ;;  %v208_v32 = vld [vmem:[#allocation3 + $0x4d0] sm:$0xff] }
 0x186   :  { %v1859_v53 = vpop.permute.xlu0 %694  ;;  %v1303_v62 = vadd.f32 %v1302_v40, %v997_v54  ;;  %v304_v54 = vld [vmem:[#allocation3 + $0x7d0] sm:$0xff]  ;;  %v273_v40 = vld [vmem:[#allocation3 + $0x6d8] sm:$0xff] }
 0x187   :  { %v1407_v7 = vadd.f32 %v1406_v37, %v1090_v36  ;;  %v1428_v8 = vadd.f32 %v1427_v45, %v1091_v29  ;;  %v1028_v52 = vmul.f32 %v1859_v53, %v236_v47  ;;  %v1029_v46 = vmul.f32 %v1859_v53, %v237_v12  ;;  %v209_v53 = vld [vmem:[#allocation3 + $0x4d8] sm:$0xff]  ;;  %v210_v29 = vld [vmem:[#allocation3 + $0x4e0] sm:$0xff] }
 0x188   :  { %v1855_v1 = vpop.permute.xlu1 %761  ;;  %v305_v47 = vld [vmem:[#allocation3 + $0x7d8] sm:$0xff] }
 0x189   :  { %v1060_v44 = vmul.f32 %v1855_v1, %v268_v21  ;;  %v1061_v25 = vmul.f32 %v1855_v1, %v269_v10  ;;  %v303_v1 = vld [vmem:[#allocation3 + $0x7c8] sm:$0xff]  ;;  %v1324_v27 = vadd.f32 %v1323_v30, %v1028_v52  ;;  %v1345_v9 = vadd.f32 %v1344_v34, %v1029_v46  ;;  %v212_v52 = vld [vmem:[#allocation3 + $0x4f0] sm:$0xff]  ;;  %v213_v46 = vld [vmem:[#allocation3 + $0x4f8] sm:$0xff] }
 0x18a   :  { %v1875_v33 = vpop.permute.xlu0 %631  ;;  %v211_v21 = vld [vmem:[#allocation3 + $0x4e8] sm:$0xff] }
 0x18b   :  { %v998_v3 = vmul.f32 %v1875_v33, %v206_v43  ;;  %v999_v5 = vmul.f32 %v1875_v33, %v207_v23  ;;  %v1366_v48 = vadd.f32 %v1365_v14, %v1060_v44  ;;  %v1387_v11 = vadd.f32 %v1386_v38, %v1061_v25  ;;  %v241_v33 = vld [vmem:[#allocation3 + $0x5d8] sm:$0xff]  ;;  %v306_v25 = vld [vmem:[#allocation3 + $0x7e0] sm:$0xff]  ;;  %v307_v23 = vld [vmem:[#allocation3 + $0x7e8] sm:$0xff] }
 0x18c   :  { %v1871_v57 = vpop.permute.xlu1 %828 }
 0x18d   :  { %v1092_v15 = vmul.f32 %v1871_v57, %v300_v42  ;;  %v1093_v0 = vmul.f32 %v1871_v57, %v301_v22  ;;  %v1283_v10 = vadd.f32 %v1282_v61, %v998_v3  ;;  %v1304_v37 = vadd.f32 %v1303_v62, %v999_v5  ;;  %v242_v42 = vld [vmem:[#allocation3 + $0x5e0] sm:$0xff]  ;;  %v243_v22 = vld [vmem:[#allocation3 + $0x5e8] sm:$0xff] }
 0x18e   :  { %v1885_v13 = vpop.permute.xlu0 %698  ;;  %v275_v61 = vld [vmem:[#allocation3 + $0x6e8] sm:$0xff] }
 0x18f   :  { %v1030_v28 = vmul.f32 %v1885_v13, %v238_v56  ;;  %v1031_v19 = vmul.f32 %v1885_v13, %v239_v60  ;;  %v1408_v20 = vadd.f32 %v1407_v7, %v1092_v15  ;;  %v1429_v4 = vadd.f32 %v1428_v8, %v1093_v0  ;;  %v272_v13 = vld [vmem:[#allocation3 + $0x6d0] sm:$0xff] }
 0x190   :  { %v1881_v16 = vpop.permute.xlu1 %765 }
 0x191   :  { %v1062_v18 = vmul.f32 %v1881_v16, %v270_v50  ;;  %v1063_v24 = vmul.f32 %v1881_v16, %v271_v63  ;;  %v1325_v39 = vadd.f32 %v1324_v27, %v1030_v28  ;;  %v244_v27 = vld [vmem:[#allocation3 + $0x5f0] sm:$0xff] }
 0x192   :  { %v636_v41 = vpop.permute.xlu0 %635 }
 0x193   :  { %v1000_v36 = vmul.f32 %v636_v41, %v208_v32  ;;  %v1001_v16 = vmul.f32 %v636_v41, %v209_v53  ;;  %v1915_v45 = vadd.f32 %v1366_v48, %v1062_v18  ;;  %v1917_v49 = vadd.f32 %v1387_v11, %v1063_v24  ;;  %v308_v48 = vld [vmem:[#allocation3 + $0x7f0] sm:$0xff]  ;;  %v309_v11 = vld [vmem:[#allocation3 + $0x7f8] sm:$0xff] }
 0x194   :  { %v833_v31 = vpop.permute.xlu1 %832 }
 0x195   :  { %v1094_v35 = vmul.f32 %v833_v31, %v302_v2  ;;  %v1095_v55 = vmul.f32 %v833_v31, %v303_v1  ;;  %v1346_v31 = vadd.f32 %v1345_v9, %v1031_v19  ;;  %v1284_v50 = vadd.f32 %v1283_v10, %v1000_v36  ;;  %v245_v9 = vld [vmem:[#allocation3 + $0x5f8] sm:$0xff] }
 0x196   :  { %v703_v51 = vpop.permute.xlu0 %702  ;;  %v1305_v63 = vadd.f32 %v1304_v37, %v1001_v16 }
 0x197   :  { %v1032_v14 = vmul.f32 %v703_v51, %v240_v17  ;;  %v1033_v38 = vmul.f32 %v703_v51, %v241_v33  ;;  %v1409_v43 = vadd.f32 %v1408_v20, %v1094_v35  ;;  %v1430_v30 = vadd.f32 %v1429_v4, %v1095_v55  ;;  %v274_v51 = vld [vmem:[#allocation3 + $0x6e0] sm:$0xff] }
 0x198   :  { %v1901_v26 = vpop.permute.xlu1 %769 }
 0x199   :  { %v1064_v56 = vmul.f32 %v1901_v26, %v272_v13  ;;  %v1065_v60 = vmul.f32 %v1901_v26, %v273_v40  ;;  %v1326_v2 = vadd.f32 %v1325_v39, %v1032_v14  ;;  %v1347_v1 = vadd.f32 %v1346_v31, %v1033_v38 }
 0x19a   :  { %v640_v57 = vpop.permute.xlu0 %639 }
 0x19b   :  { %v1002_v34 = vmul.f32 %v640_v57, %v210_v29  ;;  %v1003_v44 = vmul.f32 %v640_v57, %v211_v21 }
 0x19c   :  { %v837_v6 = vpop.permute.xlu1 %836 }
 0x19d   :  { %v1096_v7 = vmul.f32 %v837_v6, %v304_v54  ;;  %v1097_v8 = vmul.f32 %v837_v6, %v305_v47  ;;  %v1285_v24 = vadd.f32 %v1284_v50, %v1002_v34  ;;  %v1306_v32 = vadd.f32 %v1305_v63, %v1003_v44 }
 0x19e   :  { %v707_v41 = vpop.permute.xlu0 %706  ;;  %v1368_v47 = vadd.f32 %v1915_v45, %v1064_v56 }
 0x19f   :  { %v1034_v62 = vmul.f32 %v707_v41, %v242_v42  ;;  %v1035_v15 = vmul.f32 %v707_v41, %v243_v22  ;;  %v1410_v28 = vadd.f32 %v1409_v43, %v1096_v7  ;;  %v1431_v19 = vadd.f32 %v1430_v30, %v1097_v8  ;;  %v276_v22 = vld [vmem:[#allocation3 + $0x6f0] sm:$0xff]  ;;  %v277_v41 = vld [vmem:[#allocation3 + $0x6f8] sm:$0xff] }
 0x1a0   :  { %v774_v12 = vpop.permute.xlu1 %773 }
 0x1a1   :  { %v1066_v57 = vmul.f32 %v774_v12, %v274_v51  ;;  %v1067_v26 = vmul.f32 %v774_v12, %v275_v61  ;;  %v1327_v35 = vadd.f32 %v1326_v2, %v1034_v62  ;;  %v1348_v55 = vadd.f32 %v1347_v1, %v1035_v15 }
 0x1a2   :  { %v644_v18 = vpop.permute.xlu0 %643  ;;  %v1389_v12 = vadd.f32 %v1917_v49, %v1065_v60 }
 0x1a3   :  { %v1004_v53 = vmul.f32 %v644_v18, %v212_v52  ;;  %v1005_v6 = vmul.f32 %v644_v18, %v213_v46  ;;  %v1369_v43 = vadd.f32 %v1368_v47, %v1066_v57 }
 0x1a4   :  { %v841_v0 = vpop.permute.xlu1 %840  ;;  %v1390_v30 = vadd.f32 %v1389_v12, %v1067_v26 }
 0x1a5   :  { %v1098_v3 = vmul.f32 %v841_v0, %v306_v25  ;;  %v1099_v5 = vmul.f32 %v841_v0, %v307_v23  ;;  %v1286_v17 = vadd.f32 %v1285_v24, %v1004_v53  ;;  %v1307_v33 = vadd.f32 %v1306_v32, %v1005_v6 }
 0x1a6   :  { %v711_v21 = vpop.permute.xlu0 %710 }
 0x1a7   :  { %v1411_v4 = vadd.f32 %v1410_v28, %v1098_v3  ;;  %v1432_v36 = vadd.f32 %v1431_v19, %v1099_v5  ;;  %v1287_v10 = vrot.slane %v1286_v17, 4  ;;  %v1308_v37 = vrot.slane %v1307_v33, 4 }
 0x1a8   :  { %v845_v20 = vpop.permute.xlu1 %844  ;;  %v1036_v13 = vmul.f32 %v711_v21, %v244_v27  ;;  %v1037_v54 = vmul.f32 %v711_v21, %v245_v9 }
 0x1a9   :  { %v1100_v16 = vmul.f32 %v845_v20, %v308_v48  ;;  %v1101_v29 = vmul.f32 %v845_v20, %v309_v11  ;;  %v1288_v40 = vadd.f32 %v1287_v10, %v1286_v17  ;;  %v1309_v14 = vadd.f32 %v1308_v37, %v1307_v33 }
 0x1aa   :  { %v1328_v38 = vadd.f32 %v1327_v35, %v1036_v13  ;;  %v1349_v42 = vadd.f32 %v1348_v55, %v1037_v54  ;;  %v778_v25 = vpop.permute.xlu0 %777 }
 0x1ab   :  { %v1412_v39 = vadd.f32 %v1411_v4, %v1100_v16  ;;  %v1433_v31 = vadd.f32 %v1432_v36, %v1101_v29  ;;  %v1289_v23 = vrot.slane %v1288_v40, 2  ;;  %v1310_v50 = vrot.slane %v1309_v14, 2 }
 0x1ac   :  { %v1329_v63 = vrot.slane %v1328_v38, 4  ;;  %v1350_v7 = vrot.slane %v1349_v42, 4  ;;  %v1068_v49 = vmul.f32 %v778_v25, %v276_v22  ;;  %v1069_v52 = vmul.f32 %v778_v25, %v277_v41 }
 0x1ad   :  { %v1413_v34 = vrot.slane %v1412_v39, 4  ;;  %v1434_v44 = vrot.slane %v1433_v31, 4  ;;  %v1290_v46 = vadd.f32 %v1289_v23, %v1288_v40  ;;  %v1311_v56 = vadd.f32 %v1310_v50, %v1309_v14 }
 0x1ae   :  { %v1330_v60 = vadd.f32 %v1329_v63, %v1328_v38  ;;  %v1351_v51 = vadd.f32 %v1350_v7, %v1349_v42  ;;  %v1370_v15 = vadd.f32 %v1369_v43, %v1068_v49  ;;  %v1391_v0 = vadd.f32 %v1390_v30, %v1069_v52 }
 0x1af   :  { %v1414_v45 = vadd.f32 %v1413_v34, %v1412_v39  ;;  %v1435_v8 = vadd.f32 %v1434_v44, %v1433_v31  ;;  %v1291_v2 = vrot.slane %v1290_v46, 1  ;;  %v1312_v1 = vrot.slane %v1311_v56, 1 }
 0x1b0   :  { %v1331_v3 = vrot.slane %v1330_v60, 2  ;;  %v1352_v5 = vrot.slane %v1351_v51, 2  ;;  %v1371_v18 = vrot.slane %v1370_v15, 4  ;;  %v1392_v24 = vrot.slane %v1391_v0, 4 }
 0x1b1   :  { %v1415_v61 = vrot.slane %v1414_v45, 2  ;;  %v1436_v62 = vrot.slane %v1435_v8, 2  ;;  %v1292_v32 = vadd.f32 %v1291_v2, %v1290_v46  ;;  %v1313_v53 = vadd.f32 %v1312_v1, %v1311_v56 }
 0x1b2   :  { %v1332_v6 = vadd.f32 %v1331_v3, %v1330_v60  ;;  %v1353_v48 = vadd.f32 %v1352_v5, %v1351_v51  ;;  %v1372_v19 = vadd.f32 %v1371_v18, %v1370_v15  ;;  %v1393_v57 = vadd.f32 %v1392_v24, %v1391_v0  ;;  %v1495_v14 = vpop.permute.xlu0 %1494 }
 0x1b3   :  { %v1416_v11 = vadd.f32 %v1415_v61, %v1414_v45  ;;  %v1437_v28 = vadd.f32 %v1436_v62, %v1435_v8  ;;  %v1463_v26 = vsel %vm1462_vm4, %v1292_v32, %v1811_v58  ;;  %v1473_v27 = vsel %vm1462_vm4, %v1313_v53, %v1815_v59 }
 0x1b4   :  { %v1333_v9 = vrot.slane %v1332_v6, 1  ;;  %v1354_v35 = vrot.slane %v1353_v48, 1  ;;  %v1373_v55 = vrot.slane %v1372_v19, 2  ;;  %v1394_v17 = vrot.slane %v1393_v57, 2 }
 0x1b5   :  { %v1417_v16 = vrot.slane %v1416_v11, 1  ;;  %v1438_v29 = vrot.slane %v1437_v28, 1 }
 0x1b6   :  { %v1334_v33 = vadd.f32 %v1333_v9, %v1332_v6  ;;  %v1355_v20 = vadd.f32 %v1354_v35, %v1353_v48  ;;  %v1374_v4 = vadd.f32 %v1373_v55, %v1372_v19  ;;  %v1395_v36 = vadd.f32 %v1394_v17, %v1393_v57 }
 0x1b7   :  { %v1418_v59 = vadd.f32 %v1417_v16, %v1416_v11  ;;  %v1439_v47 = vadd.f32 %v1438_v29, %v1437_v28 }
 0x1b8   :  { %v1465_v21 = vsel %vm1464_vm5, %v1334_v33, %v1463_v26  ;;  %v1474_v10 = vsel %vm1464_vm5, %v1355_v20, %v1473_v27  ;;  %v1375_v37 = vrot.slane %v1374_v4, 1  ;;  %v1396_v13 = vrot.slane %v1395_v36, 1 }
 0x1ba   :  { %v1376_v58 = vadd.f32 %v1375_v37, %v1374_v4  ;;  %v1397_v54 = vadd.f32 %v1396_v13, %v1395_v36 }
 0x1bc   :  { %v1467_v12 = vsel %vm1466_vm6, %v1376_v58, %v1465_v21  ;;  %v1475_v39 = vsel %vm1466_vm6, %v1397_v54, %v1474_v10 }
 0x1bd   :  { %v1469_v31 = vsel %vm1468_vm7, %v1418_v59, %v1467_v12  ;;  %v1476_v40 = vsel %vm1468_vm7, %v1439_v47, %v1475_v39 }
 0x1be   :  { %v1497_v38 = vmul.f32 %v1495_v14, %v1469_v31  ;;  %v1498_v42 = vmul.f32 %v1495_v14, %v1476_v40 }
 0x1c0   :  { %1499 = vst [vmem:[#allocation8] sm:$0xff] %v1497_v38  ;;  %1500 = vst [vmem:[#allocation8 + $0x8] sm:$0xff] %v1498_v42 }
 0x1c1   :  { %1582 = shalt.err (!%p1579_p6)
}
 0x1c2   :  { %s1583_s10 = scalar_lea.hbm %s1939_s2, 256 }
 0x1c3   :  { %p1584_p7 = scmp.ne.s32.totalorder %s1939_s2, %s1583_s10  ;;  %p1587_p8 = scmp.lt.u32.totalorder %s1583_s10, %s1939_s2 }
 0x1c5   :  { %p1589_p9 = pnand %p1587_p8, %p1584_p7 }
 0x1c7   :  { %1592 = shalt.err (!%p1589_p9)
}
 0x1c8   :  { %1510 = dma.vmem_to_hbm [thread:$0]  %s1508_s6, 256, %s1939_s2, [#allocation5]  }
 0x1c9   :  { %1597 = dma.done.wait [#allocation5], 256  }
 0x1ca   :  { %1598 = vsyncadd [#allocation5], 4294967040 }
 0x1cb   :  { %1514 = vsyncpa [#allocation4], 1 }
 0x1cc   :  { %1515 = vsyncpa [#allocation7], 1 }
 0x1cd   :  { %1516 = vsyncpa [#allocation5], 1 }

</bundles_post_ra>
